<compile_context>
chip_gen: v7x
topology: tpu7x:2x2x1
jax: 0.10.0
libtpu: 0.0.40
codegen_flags: <defaults>
</compile_context>

<pallas_src>
import functools

import jax
import jax.numpy as jnp
from jax.experimental import pallas as pl
from jax.experimental.pallas import tpu as pltpu

NUM_LAYERS = 2  # matches the module's `num_layers = 2`


def _round_up(n, m):
    return (n + m - 1) // m * m


def _sigmoid(x):
    # Saturating sigmoid on the EUP (single tanh push); exact math, safe for
    # strongly negative pre-activations.
    return 0.5 * (jnp.tanh(0.5 * x) + 1.0)


# ----------------------------------------------------------------------------
# Parameter slab: one contiguous (N, 4H) f32 array, every section starts on a
# sublane (multiple-of-8 row) boundary.  Built ONCE at init time.
# ----------------------------------------------------------------------------
def _slab_layout(input_dim, hidden_dim):
    F, H = input_dim, hidden_dim
    offs = {}
    row = 0

    def add(name, rows):
        nonlocal row
        offs[name] = row
        row += _round_up(rows, 8)

    add("wih1", F)   # weight_ih_l0.T : (F, 4H)
    add("whh1", H)   # weight_hh_l0.T : (H, 4H)
    add("b1", 1)     # b_ih_l0 + b_hh_l0 : (1, 4H)
    add("wih2", H)   # weight_ih_l1.T : (H, 4H)
    add("whh2", H)   # weight_hh_l1.T : (H, 4H)
    add("b2", 1)     # b_ih_l1 + b_hh_l1 : (1, 4H)
    add("wfc", H)    # fc.weight.T, zero-padded to 4H columns
    add("bfc", 1)    # fc.bias,     zero-padded to 4H columns
    return offs, row


def pack_params(params, input_dim, hidden_dim):
    """Pack all parameters once into a single (N, 4H) f32 slab (init time)."""
    H = hidden_dim
    offs, nrows = _slab_layout(input_dim, hidden_dim)
    slab = jnp.zeros((nrows, 4 * H), jnp.float32)

    def put(s, name, val):
        r, c = val.shape
        return s.at[offs[name]:offs[name] + r, 0:c].set(val.astype(jnp.float32))

    for name in ("wih1", "whh1", "b1", "wih2", "whh2", "b2", "wfc", "bfc"):
        slab = put(slab, name, params[name])
    return slab


# ----------------------------------------------------------------------------
# Kernel
# ----------------------------------------------------------------------------
def _lstm_fc_kernel(x_ref, slab_ref, out_ref, pre1_ref, *, F, H, O, offs):
    T = x_ref.shape[0]

    # Hoisted parameter loads: static, sublane-aligned slices of the one slab.
    wih1 = slab_ref[offs["wih1"]:offs["wih1"] + F, :]
    whh1 = slab_ref[offs["whh1"]:offs["whh1"] + H, :]
    b1 = slab_ref[offs["b1"]:offs["b1"] + 1, :]
    wih2 = slab_ref[offs["wih2"]:offs["wih2"] + H, :]
    whh2 = slab_ref[offs["whh2"]:offs["whh2"] + H, :]
    b2 = slab_ref[offs["b2"]:offs["b2"] + 1, :]

    # Layer-1 input projection for ALL time steps in one matmul (off the serial
    # critical path), staged through VMEM scratch so each step's row is a plain
    # load carrying no dependence on the recurrence.
    pre1_ref[0:T, :] = (
        jnp.dot(x_ref[...], wih1, preferred_element_type=jnp.float32) + b1
    )

    def gates(g):
        # PyTorch gate order i | f | g | o.  One sigmoid + one tanh over the
        # whole (1, 4H) row, then slice.
        sg = _sigmoid(g)
        tg = jnp.tanh(g)
        return sg[:, 0:H], sg[:, H:2 * H], tg[:, 2 * H:3 * H], sg[:, 3 * H:4 * H]

    zeros = jnp.zeros((1, H), jnp.float32)
    h1 = c1 = h2 = c2 = zeros

    # Fully unrolled recurrence (T is static & tiny).
    # TODO(synk): further critical-path cut on v5e/v7x: explicit weight-stationary
    # MXU driving (pltpu.matmul_push_rhs / matmul_acc_lhs) for whh1/wih2/whh2.
    for t in range(T):
        # Layer-2 hidden half depends only on the PREVIOUS step's h2: issue it
        # first so it overlaps layer-1 of this step.
        g2_h = jnp.dot(h2, whh2, preferred_element_type=jnp.float32) + b2

        # Layer 1: only the hidden-state matmul is on the serial chain.
        g1 = (jnp.dot(h1, whh1, preferred_element_type=jnp.float32)
              + pre1_ref[t:t + 1, :])
        i, f, gg, o = gates(g1)
        c1 = f * c1 + i * gg
        h1 = o * jnp.tanh(c1)

        # TODO(synk): nn.LSTM inter-layer dropout(p=0.05) is train-only; eval path omits it.

        # Layer 2: un-fused (no lane concat on the critical path).
        g2 = jnp.dot(h1, wih2, preferred_element_type=jnp.float32) + g2_h
        i, f, gg, o = gates(g2)
        c2 = f * c2 + i * gg
        h2 = o * jnp.tanh(c2)

    # Final Linear on the top-layer hidden state of the LAST time step.
    # wfc is zero-padded to 4H columns in the slab; keep the first O lanes.
    wfc = slab_ref[offs["wfc"]:offs["wfc"] + H, :]
    bfc = slab_ref[offs["bfc"]:offs["bfc"] + 1, :]
    y = jnp.dot(h2, wfc, preferred_element_type=jnp.float32) + bfc
    out_ref[...] = y[:, 0:O].astype(out_ref.dtype)


# ----------------------------------------------------------------------------
# Wrapper
# ----------------------------------------------------------------------------
def neural_net_forward(x, slab, *, input_dim, hidden_dim, output_dim):
    T, F = x.shape
    assert F == input_dim
    H, O = hidden_dim, output_dim
    offs, _ = _slab_layout(input_dim, hidden_dim)
    kernel = functools.partial(_lstm_fc_kernel, F=F, H=H, O=O, offs=offs)
    vspec = pl.BlockSpec(memory_space=pltpu.MemorySpace.VMEM)
    # Whole-array VMEM residency, no grid / pipelining: total footprint < 100 KB
    # and the recurrence is strictly serial (no useful tiling or core split).
    return pl.pallas_call(
        kernel,
        out_shape=jax.ShapeDtypeStruct((1, O), jnp.float32),
        in_specs=[vspec, vspec],
        out_specs=vspec,
        scratch_shapes=[pltpu.VMEM((_round_up(T, 8), 4 * H), jnp.float32)],
    )(x, slab)


# ----------------------------------------------------------------------------
# Init + pure-JAX reference
# ----------------------------------------------------------------------------
def init_params(key, input_dim, hidden_dim, output_dim):
    """Deterministic init mimicking PyTorch's U(-1/sqrt(H), 1/sqrt(H))."""
    k = 1.0 / float(hidden_dim) ** 0.5
    keys = jax.random.split(key, 10)
    u = lambda kk, shape: jax.random.uniform(kk, shape, jnp.float32, -k, k)
    return {
        # layer 0: input_size = input_dim
        "wih1": u(keys[0], (input_dim, 4 * hidden_dim)),    # weight_ih_l0.T
        "whh1": u(keys[1], (hidden_dim, 4 * hidden_dim)),   # weight_hh_l0.T
        "b1":   u(keys[2], (1, 4 * hidden_dim)) + u(keys[3], (1, 4 * hidden_dim)),
        # layer 1: input_size = hidden_dim
        "wih2": u(keys[4], (hidden_dim, 4 * hidden_dim)),   # weight_ih_l1.T
        "whh2": u(keys[5], (hidden_dim, 4 * hidden_dim)),   # weight_hh_l1.T
        "b2":   u(keys[6], (1, 4 * hidden_dim)) + u(keys[7], (1, 4 * hidden_dim)),
        # fc
        "wfc":  u(keys[8], (hidden_dim, output_dim)),       # fc.weight.T
        "bfc":  u(keys[9], (1, output_dim)),
    }


def _reference_forward(x, params):
    """Pure-JAX reference of the same math (correctness sanity check)."""
    H = params["whh1"].shape[0]

    def cell(x_t, h, c, wih, whh, b):
        g = x_t @ wih + h @ whh + b
        i = jax.nn.sigmoid(g[:, 0:H])
        f = jax.nn.sigmoid(g[:, H:2 * H])
        gg = jnp.tanh(g[:, 2 * H:3 * H])
        o = jax.nn.sigmoid(g[:, 3 * H:4 * H])
        c = f * c + i * gg
        return o * jnp.tanh(c), c

    h1 = c1 = h2 = c2 = jnp.zeros((1, H), jnp.float32)
    for t in range(x.shape[0]):
        x_t = x[t:t + 1, :]
        h1, c1 = cell(x_t, h1, c1, params["wih1"], params["whh1"], params["b1"])
        h2, c2 = cell(h1, h2, c2, params["wih2"], params["whh2"], params["b2"])
    return h2 @ params["wfc"] + params["bfc"]


if __name__ == "__main__":
    batch_size = 8      # becomes the LSTM sequence length in the module's forward
    input_dim = 16      # == features
    hidden_dim = 32
    output_dim = 4

    key = jax.random.PRNGKey(0)
    kx, kp = jax.random.split(key)
    x = jax.random.normal(kx, (batch_size, input_dim), jnp.float32)
    params = init_params(kp, input_dim, hidden_dim, output_dim)

    # Pack parameters ONCE (init time) into a single slab -> single param DMA.
    slab = pack_params(params, input_dim, hidden_dim)

    out = neural_net_forward(x, slab, input_dim=input_dim,
                             hidden_dim=hidden_dim, output_dim=output_dim)
    out = jax.block_until_ready(out)

    ref = _reference_forward(x, params)
    assert out.shape == (1, output_dim)
    assert jnp.allclose(out, ref, atol=1e-4, rtol=1e-4), (out, ref)

    print("KERNEL_OK")
</pallas_src>

<mosaic_0001>
module attributes {stable_mosaic.version = 11 : i64} {
  func.func @_lstm_fc_kernel(%arg0: memref<8x16xf32, #tpu.memory_space<vmem>>, %arg1: memref<168x128xf32, #tpu.memory_space<vmem>>, %arg2: memref<1x4xf32, #tpu.memory_space<vmem>>, %arg3: memref<8x128xf32, #tpu.memory_space<vmem>>) attributes {dimension_semantics = [], scalar_prefetch = 0 : i64, scratch_operands = 1 : i64, tpu.core_type = #tpu.core_type<tc>} {
    %c0 = arith.constant 0 : index
    %c0_0 = arith.constant 0 : index
    %0 = vector.load %arg1[%c0, %c0_0] : memref<168x128xf32, #tpu.memory_space<vmem>>, vector<16x128xf32>
    %c16 = arith.constant 16 : index
    %c0_1 = arith.constant 0 : index
    %1 = vector.load %arg1[%c16, %c0_1] : memref<168x128xf32, #tpu.memory_space<vmem>>, vector<32x128xf32>
    %c48 = arith.constant 48 : index
    %c0_2 = arith.constant 0 : index
    %2 = vector.load %arg1[%c48, %c0_2] : memref<168x128xf32, #tpu.memory_space<vmem>>, vector<1x128xf32>
    %c56 = arith.constant 56 : index
    %c0_3 = arith.constant 0 : index
    %3 = vector.load %arg1[%c56, %c0_3] : memref<168x128xf32, #tpu.memory_space<vmem>>, vector<32x128xf32>
    %c88 = arith.constant 88 : index
    %c0_4 = arith.constant 0 : index
    %4 = vector.load %arg1[%c88, %c0_4] : memref<168x128xf32, #tpu.memory_space<vmem>>, vector<32x128xf32>
    %c120 = arith.constant 120 : index
    %c0_5 = arith.constant 0 : index
    %5 = vector.load %arg1[%c120, %c0_5] : memref<168x128xf32, #tpu.memory_space<vmem>>, vector<1x128xf32>
    %c0_6 = arith.constant 0 : index
    %c0_7 = arith.constant 0 : index
    %6 = vector.load %arg0[%c0_6, %c0_7] : memref<8x16xf32, #tpu.memory_space<vmem>>, vector<8x16xf32>
    %cst = arith.constant dense<0.000000e+00> : vector<8x128xf32>
    %7 = tpu.matmul %6, %0, %cst {dimension_numbers = #tpu.dot_dimension_numbers<[1], [0], [0], [1], [0, 0, 1, 1], [], []>} : vector<8x16xf32>, vector<16x128xf32>, vector<8x128xf32> -> vector<8x128xf32>
    %8 = vector.broadcast %2 : vector<1x128xf32> to vector<8x128xf32>
    %9 = arith.addf %7, %8 : vector<8x128xf32>
    %c0_8 = arith.constant 0 : index
    %c0_9 = arith.constant 0 : index
    %10 = vector.load %arg3[%c0_8, %c0_9] : memref<8x128xf32, #tpu.memory_space<vmem>>, vector<8x128xf32>
    tpu.vector_store %arg3[%c0_8, %c0_9], %9 {strides = array<i32>} : memref<8x128xf32, #tpu.memory_space<vmem>>, vector<8x128xf32>,
    %cst_10 = arith.constant 0.000000e+00 : f32
    %11 = vector.broadcast %cst_10 : f32 to vector<1x32xf32>
    %cst_11 = arith.constant dense<0.000000e+00> : vector<1x128xf32>
    %12 = tpu.matmul %11, %4, %cst_11 {dimension_numbers = #tpu.dot_dimension_numbers<[1], [0], [0], [1], [0, 0, 1, 1], [], []>} : vector<1x32xf32>, vector<32x128xf32>, vector<1x128xf32> -> vector<1x128xf32>
    %13 = arith.addf %12, %5 : vector<1x128xf32>
    %cst_12 = arith.constant dense<0.000000e+00> : vector<1x128xf32>
    %14 = tpu.matmul %11, %1, %cst_12 {dimension_numbers = #tpu.dot_dimension_numbers<[1], [0], [0], [1], [0, 0, 1, 1], [], []>} : vector<1x32xf32>, vector<32x128xf32>, vector<1x128xf32> -> vector<1x128xf32>
    %c0_13 = arith.constant 0 : index
    %c0_14 = arith.constant 0 : index
    %15 = vector.load %arg3[%c0_13, %c0_14] : memref<8x128xf32, #tpu.memory_space<vmem>>, vector<1x128xf32>
    %16 = arith.addf %14, %15 : vector<1x128xf32>
    %cst_15 = arith.constant 5.000000e-01 : f32
    %17 = vector.broadcast %cst_15 : f32 to vector<1x128xf32>
    %18 = arith.mulf %17, %16 : vector<1x128xf32>
    %19 = math.tanh %18 : vector<1x128xf32>
    %cst_16 = arith.constant 1.000000e+00 : f32
    %20 = vector.broadcast %cst_16 : f32 to vector<1x128xf32>
    %21 = arith.addf %19, %20 : vector<1x128xf32>
    %cst_17 = arith.constant 5.000000e-01 : f32
    %22 = vector.broadcast %cst_17 : f32 to vector<1x128xf32>
    %23 = arith.mulf %22, %21 : vector<1x128xf32>
    %24 = math.tanh %16 : vector<1x128xf32>
    %25 = vector.extract_strided_slice %23 {offsets = [0, 0], sizes = [1, 32], strides = [1, 1]} : vector<1x128xf32> to vector<1x32xf32>
    %26 = vector.extract_strided_slice %23 {offsets = [0, 32], sizes = [1, 32], strides = [1, 1]} : vector<1x128xf32> to vector<1x32xf32>
    %27 = vector.extract_strided_slice %24 {offsets = [0, 64], sizes = [1, 32], strides = [1, 1]} : vector<1x128xf32> to vector<1x32xf32>
    %28 = vector.extract_strided_slice %23 {offsets = [0, 96], sizes = [1, 32], strides = [1, 1]} : vector<1x128xf32> to vector<1x32xf32>
    %29 = arith.mulf %26, %11 : vector<1x32xf32>
    %30 = arith.mulf %25, %27 : vector<1x32xf32>
    %31 = arith.addf %29, %30 : vector<1x32xf32>
    %32 = math.tanh %31 : vector<1x32xf32>
    %33 = arith.mulf %28, %32 : vector<1x32xf32>
    %cst_18 = arith.constant dense<0.000000e+00> : vector<1x128xf32>
    %34 = tpu.matmul %33, %3, %cst_18 {dimension_numbers = #tpu.dot_dimension_numbers<[1], [0], [0], [1], [0, 0, 1, 1], [], []>} : vector<1x32xf32>, vector<32x128xf32>, vector<1x128xf32> -> vector<1x128xf32>
    %35 = arith.addf %34, %13 : vector<1x128xf32>
    %cst_19 = arith.constant 5.000000e-01 : f32
    %36 = vector.broadcast %cst_19 : f32 to vector<1x128xf32>
    %37 = arith.mulf %36, %35 : vector<1x128xf32>
    %38 = math.tanh %37 : vector<1x128xf32>
    %cst_20 = arith.constant 1.000000e+00 : f32
    %39 = vector.broadcast %cst_20 : f32 to vector<1x128xf32>
    %40 = arith.addf %38, %39 : vector<1x128xf32>
    %cst_21 = arith.constant 5.000000e-01 : f32
    %41 = vector.broadcast %cst_21 : f32 to vector<1x128xf32>
    %42 = arith.mulf %41, %40 : vector<1x128xf32>
    %43 = math.tanh %35 : vector<1x128xf32>
    %44 = vector.extract_strided_slice %42 {offsets = [0, 0], sizes = [1, 32], strides = [1, 1]} : vector<1x128xf32> to vector<1x32xf32>
    %45 = vector.extract_strided_slice %42 {offsets = [0, 32], sizes = [1, 32], strides = [1, 1]} : vector<1x128xf32> to vector<1x32xf32>
    %46 = vector.extract_strided_slice %43 {offsets = [0, 64], sizes = [1, 32], strides = [1, 1]} : vector<1x128xf32> to vector<1x32xf32>
    %47 = vector.extract_strided_slice %42 {offsets = [0, 96], sizes = [1, 32], strides = [1, 1]} : vector<1x128xf32> to vector<1x32xf32>
    %48 = arith.mulf %45, %11 : vector<1x32xf32>
    %49 = arith.mulf %44, %46 : vector<1x32xf32>
    %50 = arith.addf %48, %49 : vector<1x32xf32>
    %51 = math.tanh %50 : vector<1x32xf32>
    %52 = arith.mulf %47, %51 : vector<1x32xf32>
    %cst_22 = arith.constant dense<0.000000e+00> : vector<1x128xf32>
    %53 = tpu.matmul %52, %4, %cst_22 {dimension_numbers = #tpu.dot_dimension_numbers<[1], [0], [0], [1], [0, 0, 1, 1], [], []>} : vector<1x32xf32>, vector<32x128xf32>, vector<1x128xf32> -> vector<1x128xf32>
    %54 = arith.addf %53, %5 : vector<1x128xf32>
    %cst_23 = arith.constant dense<0.000000e+00> : vector<1x128xf32>
    %55 = tpu.matmul %33, %1, %cst_23 {dimension_numbers = #tpu.dot_dimension_numbers<[1], [0], [0], [1], [0, 0, 1, 1], [], []>} : vector<1x32xf32>, vector<32x128xf32>, vector<1x128xf32> -> vector<1x128xf32>
    %c1 = arith.constant 1 : index
    %c0_24 = arith.constant 0 : index
    %56 = vector.load %arg3[%c1, %c0_24] : memref<8x128xf32, #tpu.memory_space<vmem>>, vector<1x128xf32>
    %57 = arith.addf %55, %56 : vector<1x128xf32>
    %cst_25 = arith.constant 5.000000e-01 : f32
    %58 = vector.broadcast %cst_25 : f32 to vector<1x128xf32>
    %59 = arith.mulf %58, %57 : vector<1x128xf32>
    %60 = math.tanh %59 : vector<1x128xf32>
    %cst_26 = arith.constant 1.000000e+00 : f32
    %61 = vector.broadcast %cst_26 : f32 to vector<1x128xf32>
    %62 = arith.addf %60, %61 : vector<1x128xf32>
    %cst_27 = arith.constant 5.000000e-01 : f32
    %63 = vector.broadcast %cst_27 : f32 to vector<1x128xf32>
    %64 = arith.mulf %63, %62 : vector<1x128xf32>
    %65 = math.tanh %57 : vector<1x128xf32>
    %66 = vector.extract_strided_slice %64 {offsets = [0, 0], sizes = [1, 32], strides = [1, 1]} : vector<1x128xf32> to vector<1x32xf32>
    %67 = vector.extract_strided_slice %64 {offsets = [0, 32], sizes = [1, 32], strides = [1, 1]} : vector<1x128xf32> to vector<1x32xf32>
    %68 = vector.extract_strided_slice %65 {offsets = [0, 64], sizes = [1, 32], strides = [1, 1]} : vector<1x128xf32> to vector<1x32xf32>
    %69 = vector.extract_strided_slice %64 {offsets = [0, 96], sizes = [1, 32], strides = [1, 1]} : vector<1x128xf32> to vector<1x32xf32>
    %70 = arith.mulf %67, %31 : vector<1x32xf32>
    %71 = arith.mulf %66, %68 : vector<1x32xf32>
    %72 = arith.addf %70, %71 : vector<1x32xf32>
    %73 = math.tanh %72 : vector<1x32xf32>
    %74 = arith.mulf %69, %73 : vector<1x32xf32>
    %cst_28 = arith.constant dense<0.000000e+00> : vector<1x128xf32>
    %75 = tpu.matmul %74, %3, %cst_28 {dimension_numbers = #tpu.dot_dimension_numbers<[1], [0], [0], [1], [0, 0, 1, 1], [], []>} : vector<1x32xf32>, vector<32x128xf32>, vector<1x128xf32> -> vector<1x128xf32>
    %76 = arith.addf %75, %54 : vector<1x128xf32>
    %cst_29 = arith.constant 5.000000e-01 : f32
    %77 = vector.broadcast %cst_29 : f32 to vector<1x128xf32>
    %78 = arith.mulf %77, %76 : vector<1x128xf32>
    %79 = math.tanh %78 : vector<1x128xf32>
    %cst_30 = arith.constant 1.000000e+00 : f32
    %80 = vector.broadcast %cst_30 : f32 to vector<1x128xf32>
    %81 = arith.addf %79, %80 : vector<1x128xf32>
    %cst_31 = arith.constant 5.000000e-01 : f32
    %82 = vector.broadcast %cst_31 : f32 to vector<1x128xf32>
    %83 = arith.mulf %82, %81 : vector<1x128xf32>
    %84 = math.tanh %76 : vector<1x128xf32>
    %85 = vector.extract_strided_slice %83 {offsets = [0, 0], sizes = [1, 32], strides = [1, 1]} : vector<1x128xf32> to vector<1x32xf32>
    %86 = vector.extract_strided_slice %83 {offsets = [0, 32], sizes = [1, 32], strides = [1, 1]} : vector<1x128xf32> to vector<1x32xf32>
    %87 = vector.extract_strided_slice %84 {offsets = [0, 64], sizes = [1, 32], strides = [1, 1]} : vector<1x128xf32> to vector<1x32xf32>
    %88 = vector.extract_strided_slice %83 {offsets = [0, 96], sizes = [1, 32], strides = [1, 1]} : vector<1x128xf32> to vector<1x32xf32>
    %89 = arith.mulf %86, %50 : vector<1x32xf32>
    %90 = arith.mulf %85, %87 : vector<1x32xf32>
    %91 = arith.addf %89, %90 : vector<1x32xf32>
    %92 = math.tanh %91 : vector<1x32xf32>
    %93 = arith.mulf %88, %92 : vector<1x32xf32>
    %cst_32 = arith.constant dense<0.000000e+00> : vector<1x128xf32>
    %94 = tpu.matmul %93, %4, %cst_32 {dimension_numbers = #tpu.dot_dimension_numbers<[1], [0], [0], [1], [0, 0, 1, 1], [], []>} : vector<1x32xf32>, vector<32x128xf32>, vector<1x128xf32> -> vector<1x128xf32>
    %95 = arith.addf %94, %5 : vector<1x128xf32>
    %cst_33 = arith.constant dense<0.000000e+00> : vector<1x128xf32>
    %96 = tpu.matmul %74, %1, %cst_33 {dimension_numbers = #tpu.dot_dimension_numbers<[1], [0], [0], [1], [0, 0, 1, 1], [], []>} : vector<1x32xf32>, vector<32x128xf32>, vector<1x128xf32> -> vector<1x128xf32>
    %c2 = arith.constant 2 : index
    %c0_34 = arith.constant 0 : index
    %97 = vector.load %arg3[%c2, %c0_34] : memref<8x128xf32, #tpu.memory_space<vmem>>, vector<1x128xf32>
    %98 = arith.addf %96, %97 : vector<1x128xf32>
    %cst_35 = arith.constant 5.000000e-01 : f32
    %99 = vector.broadcast %cst_35 : f32 to vector<1x128xf32>
    %100 = arith.mulf %99, %98 : vector<1x128xf32>
    %101 = math.tanh %100 : vector<1x128xf32>
    %cst_36 = arith.constant 1.000000e+00 : f32
    %102 = vector.broadcast %cst_36 : f32 to vector<1x128xf32>
    %103 = arith.addf %101, %102 : vector<1x128xf32>
    %cst_37 = arith.constant 5.000000e-01 : f32
    %104 = vector.broadcast %cst_37 : f32 to vector<1x128xf32>
    %105 = arith.mulf %104, %103 : vector<1x128xf32>
    %106 = math.tanh %98 : vector<1x128xf32>
    %107 = vector.extract_strided_slice %105 {offsets = [0, 0], sizes = [1, 32], strides = [1, 1]} : vector<1x128xf32> to vector<1x32xf32>
    %108 = vector.extract_strided_slice %105 {offsets = [0, 32], sizes = [1, 32], strides = [1, 1]} : vector<1x128xf32> to vector<1x32xf32>
    %109 = vector.extract_strided_slice %106 {offsets = [0, 64], sizes = [1, 32], strides = [1, 1]} : vector<1x128xf32> to vector<1x32xf32>
    %110 = vector.extract_strided_slice %105 {offsets = [0, 96], sizes = [1, 32], strides = [1, 1]} : vector<1x128xf32> to vector<1x32xf32>
    %111 = arith.mulf %108, %72 : vector<1x32xf32>
    %112 = arith.mulf %107, %109 : vector<1x32xf32>
    %113 = arith.addf %111, %112 : vector<1x32xf32>
    %114 = math.tanh %113 : vector<1x32xf32>
    %115 = arith.mulf %110, %114 : vector<1x32xf32>
    %cst_38 = arith.constant dense<0.000000e+00> : vector<1x128xf32>
    %116 = tpu.matmul %115, %3, %cst_38 {dimension_numbers = #tpu.dot_dimension_numbers<[1], [0], [0], [1], [0, 0, 1, 1], [], []>} : vector<1x32xf32>, vector<32x128xf32>, vector<1x128xf32> -> vector<1x128xf32>
    %117 = arith.addf %116, %95 : vector<1x128xf32>
    %cst_39 = arith.constant 5.000000e-01 : f32
    %118 = vector.broadcast %cst_39 : f32 to vector<1x128xf32>
    %119 = arith.mulf %118, %117 : vector<1x128xf32>
    %120 = math.tanh %119 : vector<1x128xf32>
    %cst_40 = arith.constant 1.000000e+00 : f32
    %121 = vector.broadcast %cst_40 : f32 to vector<1x128xf32>
    %122 = arith.addf %120, %121 : vector<1x128xf32>
    %cst_41 = arith.constant 5.000000e-01 : f32
    %123 = vector.broadcast %cst_41 : f32 to vector<1x128xf32>
    %124 = arith.mulf %123, %122 : vector<1x128xf32>
    %125 = math.tanh %117 : vector<1x128xf32>
    %126 = vector.extract_strided_slice %124 {offsets = [0, 0], sizes = [1, 32], strides = [1, 1]} : vector<1x128xf32> to vector<1x32xf32>
    %127 = vector.extract_strided_slice %124 {offsets = [0, 32], sizes = [1, 32], strides = [1, 1]} : vector<1x128xf32> to vector<1x32xf32>
    %128 = vector.extract_strided_slice %125 {offsets = [0, 64], sizes = [1, 32], strides = [1, 1]} : vector<1x128xf32> to vector<1x32xf32>
    %129 = vector.extract_strided_slice %124 {offsets = [0, 96], sizes = [1, 32], strides = [1, 1]} : vector<1x128xf32> to vector<1x32xf32>
    %130 = arith.mulf %127, %91 : vector<1x32xf32>
    %131 = arith.mulf %126, %128 : vector<1x32xf32>
    %132 = arith.addf %130, %131 : vector<1x32xf32>
    %133 = math.tanh %132 : vector<1x32xf32>
    %134 = arith.mulf %129, %133 : vector<1x32xf32>
    %cst_42 = arith.constant dense<0.000000e+00> : vector<1x128xf32>
    %135 = tpu.matmul %134, %4, %cst_42 {dimension_numbers = #tpu.dot_dimension_numbers<[1], [0], [0], [1], [0, 0, 1, 1], [], []>} : vector<1x32xf32>, vector<32x128xf32>, vector<1x128xf32> -> vector<1x128xf32>
    %136 = arith.addf %135, %5 : vector<1x128xf32>
    %cst_43 = arith.constant dense<0.000000e+00> : vector<1x128xf32>
    %137 = tpu.matmul %115, %1, %cst_43 {dimension_numbers = #tpu.dot_dimension_numbers<[1], [0], [0], [1], [0, 0, 1, 1], [], []>} : vector<1x32xf32>, vector<32x128xf32>, vector<1x128xf32> -> vector<1x128xf32>
    %c3 = arith.constant 3 : index
    %c0_44 = arith.constant 0 : index
    %138 = vector.load %arg3[%c3, %c0_44] : memref<8x128xf32, #tpu.memory_space<vmem>>, vector<1x128xf32>
    %139 = arith.addf %137, %138 : vector<1x128xf32>
    %cst_45 = arith.constant 5.000000e-01 : f32
    %140 = vector.broadcast %cst_45 : f32 to vector<1x128xf32>
    %141 = arith.mulf %140, %139 : vector<1x128xf32>
    %142 = math.tanh %141 : vector<1x128xf32>
    %cst_46 = arith.constant 1.000000e+00 : f32
    %143 = vector.broadcast %cst_46 : f32 to vector<1x128xf32>
    %144 = arith.addf %142, %143 : vector<1x128xf32>
    %cst_47 = arith.constant 5.000000e-01 : f32
    %145 = vector.broadcast %cst_47 : f32 to vector<1x128xf32>
    %146 = arith.mulf %145, %144 : vector<1x128xf32>
    %147 = math.tanh %139 : vector<1x128xf32>
    %148 = vector.extract_strided_slice %146 {offsets = [0, 0], sizes = [1, 32], strides = [1, 1]} : vector<1x128xf32> to vector<1x32xf32>
    %149 = vector.extract_strided_slice %146 {offsets = [0, 32], sizes = [1, 32], strides = [1, 1]} : vector<1x128xf32> to vector<1x32xf32>
    %150 = vector.extract_strided_slice %147 {offsets = [0, 64], sizes = [1, 32], strides = [1, 1]} : vector<1x128xf32> to vector<1x32xf32>
    %151 = vector.extract_strided_slice %146 {offsets = [0, 96], sizes = [1, 32], strides = [1, 1]} : vector<1x128xf32> to vector<1x32xf32>
    %152 = arith.mulf %149, %113 : vector<1x32xf32>
    %153 = arith.mulf %148, %150 : vector<1x32xf32>
    %154 = arith.addf %152, %153 : vector<1x32xf32>
    %155 = math.tanh %154 : vector<1x32xf32>
    %156 = arith.mulf %151, %155 : vector<1x32xf32>
    %cst_48 = arith.constant dense<0.000000e+00> : vector<1x128xf32>
    %157 = tpu.matmul %156, %3, %cst_48 {dimension_numbers = #tpu.dot_dimension_numbers<[1], [0], [0], [1], [0, 0, 1, 1], [], []>} : vector<1x32xf32>, vector<32x128xf32>, vector<1x128xf32> -> vector<1x128xf32>
    %158 = arith.addf %157, %136 : vector<1x128xf32>
    %cst_49 = arith.constant 5.000000e-01 : f32
    %159 = vector.broadcast %cst_49 : f32 to vector<1x128xf32>
    %160 = arith.mulf %159, %158 : vector<1x128xf32>
    %161 = math.tanh %160 : vector<1x128xf32>
    %cst_50 = arith.constant 1.000000e+00 : f32
    %162 = vector.broadcast %cst_50 : f32 to vector<1x128xf32>
    %163 = arith.addf %161, %162 : vector<1x128xf32>
    %cst_51 = arith.constant 5.000000e-01 : f32
    %164 = vector.broadcast %cst_51 : f32 to vector<1x128xf32>
    %165 = arith.mulf %164, %163 : vector<1x128xf32>
    %166 = math.tanh %158 : vector<1x128xf32>
    %167 = vector.extract_strided_slice %165 {offsets = [0, 0], sizes = [1, 32], strides = [1, 1]} : vector<1x128xf32> to vector<1x32xf32>
    %168 = vector.extract_strided_slice %165 {offsets = [0, 32], sizes = [1, 32], strides = [1, 1]} : vector<1x128xf32> to vector<1x32xf32>
    %169 = vector.extract_strided_slice %166 {offsets = [0, 64], sizes = [1, 32], strides = [1, 1]} : vector<1x128xf32> to vector<1x32xf32>
    %170 = vector.extract_strided_slice %165 {offsets = [0, 96], sizes = [1, 32], strides = [1, 1]} : vector<1x128xf32> to vector<1x32xf32>
    %171 = arith.mulf %168, %132 : vector<1x32xf32>
    %172 = arith.mulf %167, %169 : vector<1x32xf32>
    %173 = arith.addf %171, %172 : vector<1x32xf32>
    %174 = math.tanh %173 : vector<1x32xf32>
    %175 = arith.mulf %170, %174 : vector<1x32xf32>
    %cst_52 = arith.constant dense<0.000000e+00> : vector<1x128xf32>
    %176 = tpu.matmul %175, %4, %cst_52 {dimension_numbers = #tpu.dot_dimension_numbers<[1], [0], [0], [1], [0, 0, 1, 1], [], []>} : vector<1x32xf32>, vector<32x128xf32>, vector<1x128xf32> -> vector<1x128xf32>
    %177 = arith.addf %176, %5 : vector<1x128xf32>
    %cst_53 = arith.constant dense<0.000000e+00> : vector<1x128xf32>
    %178 = tpu.matmul %156, %1, %cst_53 {dimension_numbers = #tpu.dot_dimension_numbers<[1], [0], [0], [1], [0, 0, 1, 1], [], []>} : vector<1x32xf32>, vector<32x128xf32>, vector<1x128xf32> -> vector<1x128xf32>
    %c4 = arith.constant 4 : index
    %c0_54 = arith.constant 0 : index
    %179 = vector.load %arg3[%c4, %c0_54] : memref<8x128xf32, #tpu.memory_space<vmem>>, vector<1x128xf32>
    %180 = arith.addf %178, %179 : vector<1x128xf32>
    %cst_55 = arith.constant 5.000000e-01 : f32
    %181 = vector.broadcast %cst_55 : f32 to vector<1x128xf32>
    %182 = arith.mulf %181, %180 : vector<1x128xf32>
    %183 = math.tanh %182 : vector<1x128xf32>
    %cst_56 = arith.constant 1.000000e+00 : f32
    %184 = vector.broadcast %cst_56 : f32 to vector<1x128xf32>
    %185 = arith.addf %183, %184 : vector<1x128xf32>
    %cst_57 = arith.constant 5.000000e-01 : f32
    %186 = vector.broadcast %cst_57 : f32 to vector<1x128xf32>
    %187 = arith.mulf %186, %185 : vector<1x128xf32>
    %188 = math.tanh %180 : vector<1x128xf32>
    %189 = vector.extract_strided_slice %187 {offsets = [0, 0], sizes = [1, 32], strides = [1, 1]} : vector<1x128xf32> to vector<1x32xf32>
    %190 = vector.extract_strided_slice %187 {offsets = [0, 32], sizes = [1, 32], strides = [1, 1]} : vector<1x128xf32> to vector<1x32xf32>
    %191 = vector.extract_strided_slice %188 {offsets = [0, 64], sizes = [1, 32], strides = [1, 1]} : vector<1x128xf32> to vector<1x32xf32>
    %192 = vector.extract_strided_slice %187 {offsets = [0, 96], sizes = [1, 32], strides = [1, 1]} : vector<1x128xf32> to vector<1x32xf32>
    %193 = arith.mulf %190, %154 : vector<1x32xf32>
    %194 = arith.mulf %189, %191 : vector<1x32xf32>
    %195 = arith.addf %193, %194 : vector<1x32xf32>
    %196 = math.tanh %195 : vector<1x32xf32>
    %197 = arith.mulf %192, %196 : vector<1x32xf32>
    %cst_58 = arith.constant dense<0.000000e+00> : vector<1x128xf32>
    %198 = tpu.matmul %197, %3, %cst_58 {dimension_numbers = #tpu.dot_dimension_numbers<[1], [0], [0], [1], [0, 0, 1, 1], [], []>} : vector<1x32xf32>, vector<32x128xf32>, vector<1x128xf32> -> vector<1x128xf32>
    %199 = arith.addf %198, %177 : vector<1x128xf32>
    %cst_59 = arith.constant 5.000000e-01 : f32
    %200 = vector.broadcast %cst_59 : f32 to vector<1x128xf32>
    %201 = arith.mulf %200, %199 : vector<1x128xf32>
    %202 = math.tanh %201 : vector<1x128xf32>
    %cst_60 = arith.constant 1.000000e+00 : f32
    %203 = vector.broadcast %cst_60 : f32 to vector<1x128xf32>
    %204 = arith.addf %202, %203 : vector<1x128xf32>
    %cst_61 = arith.constant 5.000000e-01 : f32
    %205 = vector.broadcast %cst_61 : f32 to vector<1x128xf32>
    %206 = arith.mulf %205, %204 : vector<1x128xf32>
    %207 = math.tanh %199 : vector<1x128xf32>
    %208 = vector.extract_strided_slice %206 {offsets = [0, 0], sizes = [1, 32], strides = [1, 1]} : vector<1x128xf32> to vector<1x32xf32>
    %209 = vector.extract_strided_slice %206 {offsets = [0, 32], sizes = [1, 32], strides = [1, 1]} : vector<1x128xf32> to vector<1x32xf32>
    %210 = vector.extract_strided_slice %207 {offsets = [0, 64], sizes = [1, 32], strides = [1, 1]} : vector<1x128xf32> to vector<1x32xf32>
    %211 = vector.extract_strided_slice %206 {offsets = [0, 96], sizes = [1, 32], strides = [1, 1]} : vector<1x128xf32> to vector<1x32xf32>
    %212 = arith.mulf %209, %173 : vector<1x32xf32>
    %213 = arith.mulf %208, %210 : vector<1x32xf32>
    %214 = arith.addf %212, %213 : vector<1x32xf32>
    %215 = math.tanh %214 : vector<1x32xf32>
    %216 = arith.mulf %211, %215 : vector<1x32xf32>
    %cst_62 = arith.constant dense<0.000000e+00> : vector<1x128xf32>
    %217 = tpu.matmul %216, %4, %cst_62 {dimension_numbers = #tpu.dot_dimension_numbers<[1], [0], [0], [1], [0, 0, 1, 1], [], []>} : vector<1x32xf32>, vector<32x128xf32>, vector<1x128xf32> -> vector<1x128xf32>
    %218 = arith.addf %217, %5 : vector<1x128xf32>
    %cst_63 = arith.constant dense<0.000000e+00> : vector<1x128xf32>
    %219 = tpu.matmul %197, %1, %cst_63 {dimension_numbers = #tpu.dot_dimension_numbers<[1], [0], [0], [1], [0, 0, 1, 1], [], []>} : vector<1x32xf32>, vector<32x128xf32>, vector<1x128xf32> -> vector<1x128xf32>
    %c5 = arith.constant 5 : index
    %c0_64 = arith.constant 0 : index
    %220 = vector.load %arg3[%c5, %c0_64] : memref<8x128xf32, #tpu.memory_space<vmem>>, vector<1x128xf32>
    %221 = arith.addf %219, %220 : vector<1x128xf32>
    %cst_65 = arith.constant 5.000000e-01 : f32
    %222 = vector.broadcast %cst_65 : f32 to vector<1x128xf32>
    %223 = arith.mulf %222, %221 : vector<1x128xf32>
    %224 = math.tanh %223 : vector<1x128xf32>
    %cst_66 = arith.constant 1.000000e+00 : f32
    %225 = vector.broadcast %cst_66 : f32 to vector<1x128xf32>
    %226 = arith.addf %224, %225 : vector<1x128xf32>
    %cst_67 = arith.constant 5.000000e-01 : f32
    %227 = vector.broadcast %cst_67 : f32 to vector<1x128xf32>
    %228 = arith.mulf %227, %226 : vector<1x128xf32>
    %229 = math.tanh %221 : vector<1x128xf32>
    %230 = vector.extract_strided_slice %228 {offsets = [0, 0], sizes = [1, 32], strides = [1, 1]} : vector<1x128xf32> to vector<1x32xf32>
    %231 = vector.extract_strided_slice %228 {offsets = [0, 32], sizes = [1, 32], strides = [1, 1]} : vector<1x128xf32> to vector<1x32xf32>
    %232 = vector.extract_strided_slice %229 {offsets = [0, 64], sizes = [1, 32], strides = [1, 1]} : vector<1x128xf32> to vector<1x32xf32>
    %233 = vector.extract_strided_slice %228 {offsets = [0, 96], sizes = [1, 32], strides = [1, 1]} : vector<1x128xf32> to vector<1x32xf32>
    %234 = arith.mulf %231, %195 : vector<1x32xf32>
    %235 = arith.mulf %230, %232 : vector<1x32xf32>
    %236 = arith.addf %234, %235 : vector<1x32xf32>
    %237 = math.tanh %236 : vector<1x32xf32>
    %238 = arith.mulf %233, %237 : vector<1x32xf32>
    %cst_68 = arith.constant dense<0.000000e+00> : vector<1x128xf32>
    %239 = tpu.matmul %238, %3, %cst_68 {dimension_numbers = #tpu.dot_dimension_numbers<[1], [0], [0], [1], [0, 0, 1, 1], [], []>} : vector<1x32xf32>, vector<32x128xf32>, vector<1x128xf32> -> vector<1x128xf32>
    %240 = arith.addf %239, %218 : vector<1x128xf32>
    %cst_69 = arith.constant 5.000000e-01 : f32
    %241 = vector.broadcast %cst_69 : f32 to vector<1x128xf32>
    %242 = arith.mulf %241, %240 : vector<1x128xf32>
    %243 = math.tanh %242 : vector<1x128xf32>
    %cst_70 = arith.constant 1.000000e+00 : f32
    %244 = vector.broadcast %cst_70 : f32 to vector<1x128xf32>
    %245 = arith.addf %243, %244 : vector<1x128xf32>
    %cst_71 = arith.constant 5.000000e-01 : f32
    %246 = vector.broadcast %cst_71 : f32 to vector<1x128xf32>
    %247 = arith.mulf %246, %245 : vector<1x128xf32>
    %248 = math.tanh %240 : vector<1x128xf32>
    %249 = vector.extract_strided_slice %247 {offsets = [0, 0], sizes = [1, 32], strides = [1, 1]} : vector<1x128xf32> to vector<1x32xf32>
    %250 = vector.extract_strided_slice %247 {offsets = [0, 32], sizes = [1, 32], strides = [1, 1]} : vector<1x128xf32> to vector<1x32xf32>
    %251 = vector.extract_strided_slice %248 {offsets = [0, 64], sizes = [1, 32], strides = [1, 1]} : vector<1x128xf32> to vector<1x32xf32>
    %252 = vector.extract_strided_slice %247 {offsets = [0, 96], sizes = [1, 32], strides = [1, 1]} : vector<1x128xf32> to vector<1x32xf32>
    %253 = arith.mulf %250, %214 : vector<1x32xf32>
    %254 = arith.mulf %249, %251 : vector<1x32xf32>
    %255 = arith.addf %253, %254 : vector<1x32xf32>
    %256 = math.tanh %255 : vector<1x32xf32>
    %257 = arith.mulf %252, %256 : vector<1x32xf32>
    %cst_72 = arith.constant dense<0.000000e+00> : vector<1x128xf32>
    %258 = tpu.matmul %257, %4, %cst_72 {dimension_numbers = #tpu.dot_dimension_numbers<[1], [0], [0], [1], [0, 0, 1, 1], [], []>} : vector<1x32xf32>, vector<32x128xf32>, vector<1x128xf32> -> vector<1x128xf32>
    %259 = arith.addf %258, %5 : vector<1x128xf32>
    %cst_73 = arith.constant dense<0.000000e+00> : vector<1x128xf32>
    %260 = tpu.matmul %238, %1, %cst_73 {dimension_numbers = #tpu.dot_dimension_numbers<[1], [0], [0], [1], [0, 0, 1, 1], [], []>} : vector<1x32xf32>, vector<32x128xf32>, vector<1x128xf32> -> vector<1x128xf32>
    %c6 = arith.constant 6 : index
    %c0_74 = arith.constant 0 : index
    %261 = vector.load %arg3[%c6, %c0_74] : memref<8x128xf32, #tpu.memory_space<vmem>>, vector<1x128xf32>
    %262 = arith.addf %260, %261 : vector<1x128xf32>
    %cst_75 = arith.constant 5.000000e-01 : f32
    %263 = vector.broadcast %cst_75 : f32 to vector<1x128xf32>
    %264 = arith.mulf %263, %262 : vector<1x128xf32>
    %265 = math.tanh %264 : vector<1x128xf32>
    %cst_76 = arith.constant 1.000000e+00 : f32
    %266 = vector.broadcast %cst_76 : f32 to vector<1x128xf32>
    %267 = arith.addf %265, %266 : vector<1x128xf32>
    %cst_77 = arith.constant 5.000000e-01 : f32
    %268 = vector.broadcast %cst_77 : f32 to vector<1x128xf32>
    %269 = arith.mulf %268, %267 : vector<1x128xf32>
    %270 = math.tanh %262 : vector<1x128xf32>
    %271 = vector.extract_strided_slice %269 {offsets = [0, 0], sizes = [1, 32], strides = [1, 1]} : vector<1x128xf32> to vector<1x32xf32>
    %272 = vector.extract_strided_slice %269 {offsets = [0, 32], sizes = [1, 32], strides = [1, 1]} : vector<1x128xf32> to vector<1x32xf32>
    %273 = vector.extract_strided_slice %270 {offsets = [0, 64], sizes = [1, 32], strides = [1, 1]} : vector<1x128xf32> to vector<1x32xf32>
    %274 = vector.extract_strided_slice %269 {offsets = [0, 96], sizes = [1, 32], strides = [1, 1]} : vector<1x128xf32> to vector<1x32xf32>
    %275 = arith.mulf %272, %236 : vector<1x32xf32>
    %276 = arith.mulf %271, %273 : vector<1x32xf32>
    %277 = arith.addf %275, %276 : vector<1x32xf32>
    %278 = math.tanh %277 : vector<1x32xf32>
    %279 = arith.mulf %274, %278 : vector<1x32xf32>
    %cst_78 = arith.constant dense<0.000000e+00> : vector<1x128xf32>
    %280 = tpu.matmul %279, %3, %cst_78 {dimension_numbers = #tpu.dot_dimension_numbers<[1], [0], [0], [1], [0, 0, 1, 1], [], []>} : vector<1x32xf32>, vector<32x128xf32>, vector<1x128xf32> -> vector<1x128xf32>
    %281 = arith.addf %280, %259 : vector<1x128xf32>
    %cst_79 = arith.constant 5.000000e-01 : f32
    %282 = vector.broadcast %cst_79 : f32 to vector<1x128xf32>
    %283 = arith.mulf %282, %281 : vector<1x128xf32>
    %284 = math.tanh %283 : vector<1x128xf32>
    %cst_80 = arith.constant 1.000000e+00 : f32
    %285 = vector.broadcast %cst_80 : f32 to vector<1x128xf32>
    %286 = arith.addf %284, %285 : vector<1x128xf32>
    %cst_81 = arith.constant 5.000000e-01 : f32
    %287 = vector.broadcast %cst_81 : f32 to vector<1x128xf32>
    %288 = arith.mulf %287, %286 : vector<1x128xf32>
    %289 = math.tanh %281 : vector<1x128xf32>
    %290 = vector.extract_strided_slice %288 {offsets = [0, 0], sizes = [1, 32], strides = [1, 1]} : vector<1x128xf32> to vector<1x32xf32>
    %291 = vector.extract_strided_slice %288 {offsets = [0, 32], sizes = [1, 32], strides = [1, 1]} : vector<1x128xf32> to vector<1x32xf32>
    %292 = vector.extract_strided_slice %289 {offsets = [0, 64], sizes = [1, 32], strides = [1, 1]} : vector<1x128xf32> to vector<1x32xf32>
    %293 = vector.extract_strided_slice %288 {offsets = [0, 96], sizes = [1, 32], strides = [1, 1]} : vector<1x128xf32> to vector<1x32xf32>
    %294 = arith.mulf %291, %255 : vector<1x32xf32>
    %295 = arith.mulf %290, %292 : vector<1x32xf32>
    %296 = arith.addf %294, %295 : vector<1x32xf32>
    %297 = math.tanh %296 : vector<1x32xf32>
    %298 = arith.mulf %293, %297 : vector<1x32xf32>
    %cst_82 = arith.constant dense<0.000000e+00> : vector<1x128xf32>
    %299 = tpu.matmul %298, %4, %cst_82 {dimension_numbers = #tpu.dot_dimension_numbers<[1], [0], [0], [1], [0, 0, 1, 1], [], []>} : vector<1x32xf32>, vector<32x128xf32>, vector<1x128xf32> -> vector<1x128xf32>
    %300 = arith.addf %299, %5 : vector<1x128xf32>
    %cst_83 = arith.constant dense<0.000000e+00> : vector<1x128xf32>
    %301 = tpu.matmul %279, %1, %cst_83 {dimension_numbers = #tpu.dot_dimension_numbers<[1], [0], [0], [1], [0, 0, 1, 1], [], []>} : vector<1x32xf32>, vector<32x128xf32>, vector<1x128xf32> -> vector<1x128xf32>
    %c7 = arith.constant 7 : index
    %c0_84 = arith.constant 0 : index
    %302 = vector.load %arg3[%c7, %c0_84] : memref<8x128xf32, #tpu.memory_space<vmem>>, vector<1x128xf32>
    %303 = arith.addf %301, %302 : vector<1x128xf32>
    %cst_85 = arith.constant 5.000000e-01 : f32
    %304 = vector.broadcast %cst_85 : f32 to vector<1x128xf32>
    %305 = arith.mulf %304, %303 : vector<1x128xf32>
    %306 = math.tanh %305 : vector<1x128xf32>
    %cst_86 = arith.constant 1.000000e+00 : f32
    %307 = vector.broadcast %cst_86 : f32 to vector<1x128xf32>
    %308 = arith.addf %306, %307 : vector<1x128xf32>
    %cst_87 = arith.constant 5.000000e-01 : f32
    %309 = vector.broadcast %cst_87 : f32 to vector<1x128xf32>
    %310 = arith.mulf %309, %308 : vector<1x128xf32>
    %311 = math.tanh %303 : vector<1x128xf32>
    %312 = vector.extract_strided_slice %310 {offsets = [0, 0], sizes = [1, 32], strides = [1, 1]} : vector<1x128xf32> to vector<1x32xf32>
    %313 = vector.extract_strided_slice %310 {offsets = [0, 32], sizes = [1, 32], strides = [1, 1]} : vector<1x128xf32> to vector<1x32xf32>
    %314 = vector.extract_strided_slice %311 {offsets = [0, 64], sizes = [1, 32], strides = [1, 1]} : vector<1x128xf32> to vector<1x32xf32>
    %315 = vector.extract_strided_slice %310 {offsets = [0, 96], sizes = [1, 32], strides = [1, 1]} : vector<1x128xf32> to vector<1x32xf32>
    %316 = arith.mulf %313, %277 : vector<1x32xf32>
    %317 = arith.mulf %312, %314 : vector<1x32xf32>
    %318 = arith.addf %316, %317 : vector<1x32xf32>
    %319 = math.tanh %318 : vector<1x32xf32>
    %320 = arith.mulf %315, %319 : vector<1x32xf32>
    %cst_88 = arith.constant dense<0.000000e+00> : vector<1x128xf32>
    %321 = tpu.matmul %320, %3, %cst_88 {dimension_numbers = #tpu.dot_dimension_numbers<[1], [0], [0], [1], [0, 0, 1, 1], [], []>} : vector<1x32xf32>, vector<32x128xf32>, vector<1x128xf32> -> vector<1x128xf32>
    %322 = arith.addf %321, %300 : vector<1x128xf32>
    %cst_89 = arith.constant 5.000000e-01 : f32
    %323 = vector.broadcast %cst_89 : f32 to vector<1x128xf32>
    %324 = arith.mulf %323, %322 : vector<1x128xf32>
    %325 = math.tanh %324 : vector<1x128xf32>
    %cst_90 = arith.constant 1.000000e+00 : f32
    %326 = vector.broadcast %cst_90 : f32 to vector<1x128xf32>
    %327 = arith.addf %325, %326 : vector<1x128xf32>
    %cst_91 = arith.constant 5.000000e-01 : f32
    %328 = vector.broadcast %cst_91 : f32 to vector<1x128xf32>
    %329 = arith.mulf %328, %327 : vector<1x128xf32>
    %330 = math.tanh %322 : vector<1x128xf32>
    %331 = vector.extract_strided_slice %329 {offsets = [0, 0], sizes = [1, 32], strides = [1, 1]} : vector<1x128xf32> to vector<1x32xf32>
    %332 = vector.extract_strided_slice %329 {offsets = [0, 32], sizes = [1, 32], strides = [1, 1]} : vector<1x128xf32> to vector<1x32xf32>
    %333 = vector.extract_strided_slice %330 {offsets = [0, 64], sizes = [1, 32], strides = [1, 1]} : vector<1x128xf32> to vector<1x32xf32>
    %334 = vector.extract_strided_slice %329 {offsets = [0, 96], sizes = [1, 32], strides = [1, 1]} : vector<1x128xf32> to vector<1x32xf32>
    %335 = arith.mulf %332, %296 : vector<1x32xf32>
    %336 = arith.mulf %331, %333 : vector<1x32xf32>
    %337 = arith.addf %335, %336 : vector<1x32xf32>
    %338 = math.tanh %337 : vector<1x32xf32>
    %339 = arith.mulf %334, %338 : vector<1x32xf32>
    %c128 = arith.constant 128 : index
    %c0_92 = arith.constant 0 : index
    %340 = vector.load %arg1[%c128, %c0_92] : memref<168x128xf32, #tpu.memory_space<vmem>>, vector<32x128xf32>
    %c160 = arith.constant 160 : index
    %c0_93 = arith.constant 0 : index
    %341 = vector.load %arg1[%c160, %c0_93] : memref<168x128xf32, #tpu.memory_space<vmem>>, vector<1x128xf32>
    %cst_94 = arith.constant dense<0.000000e+00> : vector<1x128xf32>
    %342 = tpu.matmul %339, %340, %cst_94 {dimension_numbers = #tpu.dot_dimension_numbers<[1], [0], [0], [1], [0, 0, 1, 1], [], []>} : vector<1x32xf32>, vector<32x128xf32>, vector<1x128xf32> -> vector<1x128xf32>
    %343 = arith.addf %342, %341 : vector<1x128xf32>
    %344 = vector.extract_strided_slice %343 {offsets = [0, 0], sizes = [1, 4], strides = [1, 1]} : vector<1x128xf32> to vector<1x4xf32>
    %c0_95 = arith.constant 0 : index
    %c0_96 = arith.constant 0 : index
    %345 = vector.load %arg2[%c0_95, %c0_96] : memref<1x4xf32, #tpu.memory_space<vmem>>, vector<1x4xf32>
    tpu.vector_store %arg2[%c0_95, %c0_96], %344 {strides = array<i32>} : memref<1x4xf32, #tpu.memory_space<vmem>>, vector<1x4xf32>,
    return
  }
}

</mosaic_0001>

<bundles_post_ra>
// kernel: tpu_custom_call.1
= control target key start
LH: loop header
LB: loop body
LE: loop exit
PB: predicated region body
PF: predicated region fallthrough
CT: control target
= control target key end

     0   :  { %7 = vsyncpa [#allocation4], 0  ;;  %s3515_s0 = inlined_call_operand.hbm [shape: f32[8,16], index: 0, kind: input, shape index: {}]   ;;  %s3516_s1 = inlined_call_operand.hbm [shape: f32[168,128], index: 1, kind: input, shape index: {}]   ;;  %s3517_s2 = inlined_call_operand.hbm [shape: f32[1,4], index: 2, kind: output, shape index: {}]  }
   0x1   :  { %8 = vsyncpa [#allocation7], 0 }
   0x2   :  { %9 = vsyncpa [#allocation5], 0  ;;  %s3141_s9 = smov [#allocation3]   ;;  %s3142_s11 = smov [#allocation6]  }
   0x3   :  { %s16_s10 = sshll.u32 %s3141_s9, 4  ;;  %s25_s12 = sshll.u32 %s3142_s11, 4  ;;  %s17_s10 = int_to_ptr.vmem [resolvable:$true] %s16_s10  ;;  %s3166_s12 = int_to_ptr.vmem [resolvable:$true] %s25_s12 }
   0x4   :  { %s3069_s15 = scalar_lea.hbm %s3515_s0, 128 }
   0x5   :  { %p3070_p0 = scmp.ne.s32.totalorder %s3515_s0, %s3069_s15  ;;  %p3073_p1 = scmp.lt.u32.totalorder %s3069_s15, %s3515_s0 }
   0x7   :  { %p3075_p2 = pnand %p3073_p1, %p3070_p0 }
   0x9   :  { %3078 = shalt.err (!%p3075_p2)
}
   0xa   :  { %s3079_s20 = scalar_lea.vmem %s17_s10, 128  ;;  %p3084_p4 = scmp.lt.s32.totalorder %s17_s10, %s17_s10 }
   0xb   :  { %p3080_p3 = scmp.ne.s32.totalorder %s17_s10, %s3079_s20  ;;  %p3085_p5 = scmp.lt.s32.totalorder %s3079_s20, %s3079_s20 }
   0xd   :  { %p3086_p6 = por %p3085_p5, %p3084_p4 }
   0xf   :  { %p3087_p7 = pnand %p3086_p6, %p3080_p3 }
  0x11   :  { %3090 = shalt.err (!%p3087_p7)
}
  0x12   :  { %19 = dma.hbm_to_vmem [thread:$0]  %s3515_s0, 128, %s17_s10, [#allocation4]  }
  0x13   :  { %s3091_s25 = scalar_lea.hbm %s3516_s1, 2688 }
  0x14   :  { %p3092_p8 = scmp.ne.s32.totalorder %s3516_s1, %s3091_s25  ;;  %p3095_p9 = scmp.lt.u32.totalorder %s3091_s25, %s3516_s1 }
  0x16   :  { %p3097_p10 = pnand %p3095_p9, %p3092_p8 }
  0x18   :  { %3100 = shalt.err (!%p3097_p10)
}
  0x19   :  { %s3101_s30 = scalar_lea.vmem %s3166_s12, 2688  ;;  %p3106_p12 = scmp.lt.s32.totalorder %s3166_s12, %s3166_s12 }
  0x1a   :  { %p3102_p11 = scmp.ne.s32.totalorder %s3166_s12, %s3101_s30  ;;  %p3107_p13 = scmp.lt.s32.totalorder %s3101_s30, %s3101_s30 }
  0x1c   :  { %p3108_p0 = por %p3107_p13, %p3106_p12 }
  0x1e   :  { %p3109_p1 = pnand %p3108_p0, %p3102_p11 }
  0x20   :  { %3112 = shalt.err (!%p3109_p1)
}
  0x21   :  { %s3143_s0 = smov 128   ;;  %s3144_s3 = smov 8  }
  0x22   :  { %31 = dma.hbm_to_vmem [thread:$0]  %s3516_s1, 2688, %s3166_s12, [#allocation7], %s3143_s0, %s3143_s0, %s3144_s3  }
  0x23   :  { %3135 = dma.done.wait [#allocation4], 128  }
  0x24   :  { %3136 = vsyncadd [#allocation4], 4294967168 }
  0x25   :  { %3137 = dma.done.wait [#allocation7], 2688  }
  0x26   :  { %3138 = vsyncadd [#allocation7], 4294964608  ;;  %v3145_v0 = vmov 0.0|0.0   ;;  %vm3146_vm0 = vmmov 0   ;;  %v3147_v1 = vmov 0.0   ;;  %v38_v2 = vld [vmem:[#allocation6] sm:$0xff] }
  0x27   :  { %2786 = vmatprep.subr.bf16.mxu0 %v3145_v0  ;;  %2508 = vmatprep.mubr.msk.f32.mxu0 %vm3146_vm0, %v3147_v1  ;;  %v39_v3 = vld [vmem:[#allocation6 + $0x8] sm:$0xff]  ;;  %v40_v5 = vld [vmem:[#allocation6 + $0x10] sm:$0xff]  ;;  %v41_v6 = vld [vmem:[#allocation6 + $0x18] sm:$0xff]  ;;  %vm59_vm1 = vcmask 130048   ;;  %s3148_s1 = smov 64   ;;  %s3149_s6 = smov 32  }
  0x28   :  { %2789 = vmatprep.subr.bf16.mxu1 %v3145_v0  ;;  %2519 = vmatprep.mubr.msk.f32.mxu1 %vm3146_vm0, %v3147_v1  ;;  %v2787_v4 = vpack.c.bf16 %v39_v3, %v38_v2  ;;  %v54_v7 = vld [vmem:[#allocation3] sm:$0xff]  ;;  %v3203_v8 = vpack.c.bf16 %v41_v6, %v40_v5  ;;  %v42_v9 = vld [vmem:[#allocation6 + $0x20] sm:$0xff]  ;;  %v43_v10 = vld [vmem:[#allocation6 + $0x28] sm:$0xff]  ;;  %vm134_vm2 = vcmask 261120   ;;  %s3150_s7 = smov [#allocation8]   ;;  %vm2333_vm3 = vcmask 24576  }
  0x29   :  { %v3207_v11 = vpack.c.bf16 %v43_v10, %v42_v9  ;;  %v2351_v12 = vld [vmem:[#allocation6 + $0x30] ss:$0 sm:$0xff]  ;;  %v49_v30 = vld [vmem:[#allocation6 + $0x58] sm:$0xff]  ;;  %v50_v31 = vld [vmem:[#allocation6 + $0x60] sm:$0xff]  ;;  %s2341_s8 = sshll.u32 %s3150_s7, 4  ;;  %s2342_s8 = int_to_ptr.vmem [resolvable:$true] %s2341_s8 }
  0x2a   :  { %2788 = vmatpush3.bf16.msra.mxu0 %v2787_v4  ;;  %v51_v32 = vld [vmem:[#allocation6 + $0x68] sm:$0xff]  ;;  %v3222_v33 = vpack.c.bf16 %v50_v31, %v49_v30  ;;  %v52_v34 = vld [vmem:[#allocation6 + $0x70] sm:$0xff]  ;;  %v45_v36 = vld [vmem:[#allocation6 + $0x38] sm:$0xff]  ;;  %s3113_s9 = scalar_lea.vmem %s2342_s8, 16  ;;  %s3117_s10 = scalar_lea.vmem %s2342_s8, 32 }
  0x2b   :  { %2795 = vmatprep.subr.bf16.mxu0 %v3145_v0  ;;  %v3225_v35 = vpack.c.bf16 %v52_v34, %v51_v32  ;;  %v46_v37 = vld [vmem:[#allocation6 + $0x40] sm:$0xff]  ;;  %v47_v39 = vld [vmem:[#allocation6 + $0x48] sm:$0xff]  ;;  %v48_v40 = vld [vmem:[#allocation6 + $0x50] sm:$0xff]  ;;  %p3114_p2 = scmp.ne.s32.totalorder %s2342_s8, %s3113_s9  ;;  %p3118_p3 = scmp.lt.s32.totalorder %s2342_s8, %s2342_s8 }
  0x2c   :  { %2791 = vmatpush3.bf16.msra.mxu1 %v3222_v33  ;;  %v3231_v38 = vpack.c.bf16 %v46_v37, %v45_v36  ;;  %v3239_v42 = vpack.c.bf16 %v48_v40, %v47_v39  ;;  %v3261_v46 = vld [vmem:[#allocation6 + $0x78] sm:$0x1]  ;;  %p3119_p4 = scmp.lt.s32.totalorder %s3117_s10, %s3113_s9 }
  0x2d   :  { %2509 = vmatmul.mubr.msk.f32.vlgmr.msra.gmra.mrb[0].mxu0 %vm59_vm1, %v54_v7  ;;  %2792 = vmatprep.subr.bf16.mxu1 %v3145_v0 }
  0x2e   :  { %2797 = vmatpush3.bf16.msra.mxu0 %v3203_v8  ;;  %2530 = vmatprep.mubr.msk.f32.mxu0 %vm3146_vm0, %v3147_v1  ;;  %p3120_p5 = por %p3119_p4, %p3118_p3 }
  0x2f   :  { %2798 = vmatprep.subr.bf16.mxu0 %v3145_v0 }
  0x30   :  { %2794 = vmatpush3.bf16.msra.mxu1 %v3225_v35  ;;  %p3121_p6 = pnand %p3120_p5, %p3114_p2 }
  0x31   :  { %2801 = vmatprep.subr.bf16.mxu1 %v3145_v0 }
  0x32   :  { %2800 = vmatpush3.bf16.msra.mxu0 %v3207_v11 }
  0x33   :  { %2807 = vmatprep.subr.bf16.mxu0 %v3145_v0  ;;  %2520 = vmatmul.mubr.f32.vlgmr.msra.gmra.mrb[0].mxu1 %v3147_v1 }
  0x34   :  { %2803 = vmatpush3.bf16.msra.mxu1 %v3231_v38  ;;  %2541 = vmatprep.mubr.msk.f32.mxu1 %vm3146_vm0, %v3147_v1 }
  0x35   :  { %2531 = vmatmul.mubr.f32.vlgmr.msra.gmra.mrb[2].mxu0 %v3147_v1  ;;  %2804 = vmatprep.subr.bf16.mxu1 %v3145_v0 }
  0x36   :  { %2552 = vmatprep.mubr.msk.f32.mxu0 %vm3146_vm0, %v3147_v1  ;;  %2809 = vmatpush3.bf16.msra.mxu0 %v3222_v33 }
  0x37   :  { %2810 = vmatprep.subr.bf16.mxu0 %v3145_v0 }
  0x38   :  { %2806 = vmatpush3.bf16.msra.mxu1 %v3239_v42 }
  0x39   :  { %2813 = vmatprep.subr.bf16.mxu1 %v3145_v0 }
  0x3a   :  { %2812 = vmatpush3.bf16.msra.mxu0 %v3225_v35 }
  0x3b   :  { %2819 = vmatprep.subr.bf16.mxu0 %v3145_v0 }
 0x100   :  { %v129_v13 = vpop.f32.mrb[0].mxu0 }
 0x101   :  { %v130_v14 = vadd.f32 %v2351_v12, %v129_v13  ;;  %v2510_v15 = vpop.f32.mrb[1].mxu0 }
 0x103   :  { %133 = vst [vmem:[#allocation2] sm:$0xff] %v130_v14 }
 0x108   :  { %v275_v16 = vpop.f32.mrb[2].mxu0 }
 0x109   :  { %v2532_v17 = vpop.f32.mrb[3].mxu0 }
 0x10a   :  { %v208_v18 = vld [vmem:[#allocation2] sm:$0x1]  ;;  %v473_v50 = vld [vmem:[#allocation2 + $0x1] sm:$0x1] }
 0x10b   :  { %v276_v19 = vadd.f32 %v275_v16, %v208_v18 }
 0x10d   :  { %2973 = vtanh.f32 %v276_v19  ;;  %v279_v21 = vmul.f32 0.5, %v276_v19 }
 0x10f   :  { %2975 = vtanh.f32 %v279_v21 }
 0x117   :  { %v2974_v20 = vpop.eup %2973 }
 0x118   :  { %286 = vrot.lane.b32.xlu0 %v2974_v20, %s3148_s1 }
 0x119   :  { %v2976_v22 = vpop.eup %2975 }
 0x11a   :  { %v281_v23 = vadd.f32 1.0, %v2976_v22 }
 0x11c   :  { %v282_v24 = vmul.f32 0.5, %v281_v23 }
 0x11e   :  { %v284_v27 = vmul.f32 0.0, %v282_v24 }
 0x18a   :  { %v287_v25 = vpop.permute.xlu0 %286 }
 0x18b   :  { %v289_v26 = vmul.f32 %v287_v25, %v282_v24  ;;  %v738_v25 = vld [vmem:[#allocation2 + $0x2] sm:$0x1] }
 0x18d   :  { %291 = vrot.lane.b32.xlu0 %v289_v26, %s3149_s6 }
 0x1ff   :  { %v292_v28 = vpop.permute.xlu0 %291 }
 0x200   :  { %v3219_v29 = vadd.f32 %v292_v28, %v284_v27 }
 0x202   :  { %2977 = vtanh.f32 %v3219_v29 }
 0x20c   :  { %v2978_v41 = vpop.eup %2977 }
 0x20d   :  { %297 = vrot.lane.b32.xlu1 %v2978_v41, %s3148_s1 }
 0x27f   :  { %v298_v43 = vpop.permute.xlu1 %297 }
 0x280   :  { %v300_v44 = vmul.f32 %v298_v43, %v282_v24 }
 0x282   :  { %302 = vrot.lane.b32.xlu1 %v300_v44, %s3149_s6 }
 0x2f4   :  { %v303_v45 = vpop.permute.xlu1 %302 }
 0x2f5   :  { %2542 = vmatmul.mubr.msk.f32.vlgmr.msra.gmra.mrb[0].mxu1 %vm134_vm2, %v303_v45 }
 0x2f6   :  { %2815 = vmatpush3.bf16.msra.mxu1 %v3203_v8  ;;  %2563 = vmatprep.mubr.msk.f32.mxu1 %vm3146_vm0, %v3147_v1 }
 0x2f7   :  { %2816 = vmatprep.subr.bf16.mxu1 %v3145_v0 }
 0x2fa   :  { %2818 = vmatpush3.bf16.msra.mxu1 %v3207_v11 }
 0x2fb   :  { %2825 = vmatprep.subr.bf16.mxu1 %v3145_v0 }
 0x2fd   :  { %2564 = vmatmul.mubr.msk.f32.vlgmr.msra.gmra.mrb[2].mxu1 %vm134_vm2, %v303_v45 }
 0x2fe   :  { %2827 = vmatpush3.bf16.msra.mxu1 %v3222_v33  ;;  %2585 = vmatprep.mubr.msk.f32.mxu1 %vm3146_vm0, %v3147_v1 }
 0x2ff   :  { %2828 = vmatprep.subr.bf16.mxu1 %v3145_v0 }
 0x302   :  { %2830 = vmatpush3.bf16.msra.mxu1 %v3225_v35 }
 0x303   :  { %2837 = vmatprep.subr.bf16.mxu1 %v3145_v0 }
 0x3c8   :  { %v372_v47 = vpop.f32.mrb[0].mxu1 }
 0x3c9   :  { %v2939_v48 = vadd.f32 %v372_v47, %v3261_v46  ;;  %v2543_v49 = vpop.f32.mrb[1].mxu1 }
 0x3cb   :  { %2979 = vtanh.f32 %v2939_v48  ;;  %v376_v56 = vmul.f32 0.5, %v2939_v48 }
 0x3d0   :  { %v540_v51 = vpop.f32.mrb[2].mxu1 }
 0x3d1   :  { %v541_v52 = vadd.f32 %v540_v51, %v473_v50  ;;  %v2565_v53 = vpop.f32.mrb[3].mxu1 }
 0x3d3   :  { %2981 = vtanh.f32 %v541_v52  ;;  %v544_v57 = vmul.f32 0.5, %v541_v52 }
 0x3d4   :  { %2983 = vtanh.f32 %v376_v56 }
 0x3d5   :  { %v2980_v54 = vpop.eup %2979  ;;  %2985 = vtanh.f32 %v544_v57 }
 0x3d6   :  { %383 = vrot.lane.b32.xlu0 %v2980_v54, %s3148_s1 }
 0x3dd   :  { %v2982_v55 = vpop.eup %2981 }
 0x3de   :  { %551 = vrot.lane.b32.xlu1 %v2982_v55, %s3148_s1  ;;  %v2984_v58 = vpop.eup %2983 }
 0x3df   :  { %v378_v59 = vadd.f32 1.0, %v2984_v58  ;;  %v2986_v61 = vpop.eup %2985 }
 0x3e0   :  { %v546_v2 = vadd.f32 1.0, %v2986_v61 }
 0x3e1   :  { %v379_v60 = vmul.f32 0.5, %v378_v59 }
 0x3e2   :  { %v547_v3 = vmul.f32 0.5, %v546_v2 }
 0x3e3   :  { %v381_v6 = vmul.f32 0.0, %v379_v60 }
 0x3e4   :  { %v549_v10 = vmul.f32 %v547_v3, %v3219_v29 }
 0x448   :  { %v384_v62 = vpop.permute.xlu0 %383 }
 0x449   :  { %v386_v63 = vmul.f32 %v384_v62, %v379_v60 }
 0x44b   :  { %388 = vrot.lane.b32.xlu0 %v386_v63, %s3149_s6 }
 0x450   :  { %v552_v4 = vpop.permute.xlu1 %551 }
 0x451   :  { %v554_v5 = vmul.f32 %v552_v4, %v547_v3 }
 0x453   :  { %556 = vrot.lane.b32.xlu1 %v554_v5, %s3149_s6 }
 0x4bd   :  { %v389_v7 = vpop.permute.xlu0 %388 }
 0x4be   :  { %v3268_v9 = vadd.f32 %v389_v7, %v381_v6 }
 0x4c0   :  { %2987 = vtanh.f32 %v3268_v9 }
 0x4c5   :  { %v557_v12 = vpop.permute.xlu1 %556 }
 0x4c6   :  { %v3272_v13 = vadd.f32 %v557_v12, %v549_v10 }
 0x4c8   :  { %2989 = vtanh.f32 %v3272_v13 }
 0x4ca   :  { %v2988_v14 = vpop.eup %2987 }
 0x4cb   :  { %394 = vrot.lane.b32.xlu0 %v2988_v14, %s3148_s1 }
 0x4d2   :  { %v2990_v15 = vpop.eup %2989 }
 0x4d3   :  { %562 = vrot.lane.b32.xlu1 %v2990_v15, %s3148_s1 }
 0x53d   :  { %v395_v16 = vpop.permute.xlu0 %394 }
 0x53e   :  { %v397_v17 = vmul.f32 %v395_v16, %v379_v60 }
 0x540   :  { %399 = vrot.lane.b32.xlu0 %v397_v17, %s3149_s6 }
 0x545   :  { %v563_v18 = vpop.permute.xlu1 %562 }
 0x546   :  { %v565_v19 = vmul.f32 %v563_v18, %v547_v3  ;;  %v1003_v3 = vld [vmem:[#allocation2 + $0x3] sm:$0x1] }
 0x548   :  { %567 = vrot.lane.b32.xlu1 %v565_v19, %s3149_s6 }
 0x5b2   :  { %v400_v20 = vpop.permute.xlu0 %399 }
 0x5b3   :  { %2553 = vmatmul.mubr.msk.f32.vlgmr.msra.gmra.mrb[4].mxu0 %vm134_vm2, %v400_v20 }
 0x5b4   :  { %2821 = vmatpush3.bf16.msra.mxu0 %v3231_v38  ;;  %2574 = vmatprep.mubr.msk.f32.mxu0 %vm3146_vm0, %v3147_v1 }
 0x5b5   :  { %2822 = vmatprep.subr.bf16.mxu0 %v3145_v0 }
 0x5b8   :  { %2824 = vmatpush3.bf16.msra.mxu0 %v3239_v42 }
 0x5b9   :  { %2831 = vmatprep.subr.bf16.mxu0 %v3145_v0 }
 0x5ba   :  { %v568_v21 = vpop.permute.xlu1 %567 }
 0x5bb   :  { %2575 = vmatmul.mubr.msk.f32.vlgmr.msra.gmra.mrb[4].mxu0 %vm134_vm2, %v568_v21 }
 0x5bc   :  { %2833 = vmatpush3.bf16.msra.mxu0 %v3203_v8  ;;  %2596 = vmatprep.mubr.msk.f32.mxu0 %vm3146_vm0, %v3147_v1 }
 0x5bd   :  { %2834 = vmatprep.subr.bf16.mxu0 %v3145_v0 }
 0x5c0   :  { %2836 = vmatpush3.bf16.msra.mxu0 %v3207_v11 }
 0x5c1   :  { %2843 = vmatprep.subr.bf16.mxu0 %v3145_v0 }
 0x5c3   :  { %2597 = vmatmul.mubr.msk.f32.vlgmr.msra.gmra.mrb[6].mxu0 %vm134_vm2, %v568_v21 }
 0x5c4   :  { %2845 = vmatpush3.bf16.msra.mxu0 %v3222_v33  ;;  %2618 = vmatprep.mubr.msk.f32.mxu0 %vm3146_vm0, %v3147_v1 }
 0x5c5   :  { %2846 = vmatprep.subr.bf16.mxu0 %v3145_v0 }
 0x5c8   :  { %2848 = vmatpush3.bf16.msra.mxu0 %v3225_v35 }
 0x5c9   :  { %2855 = vmatprep.subr.bf16.mxu0 %v3145_v0 }
 0x68e   :  { %v637_v22 = vpop.f32.mrb[4].mxu0 }
 0x68f   :  { %v2940_v23 = vadd.f32 %v637_v22, %v3261_v46  ;;  %v2576_v24 = vpop.f32.mrb[5].mxu0 }
 0x691   :  { %2991 = vtanh.f32 %v2940_v23  ;;  %v641_v31 = vmul.f32 0.5, %v2940_v23 }
 0x696   :  { %v805_v26 = vpop.f32.mrb[6].mxu0 }
 0x697   :  { %v806_v27 = vadd.f32 %v805_v26, %v738_v25  ;;  %v2598_v28 = vpop.f32.mrb[7].mxu0 }
 0x699   :  { %2993 = vtanh.f32 %v806_v27  ;;  %v809_v32 = vmul.f32 0.5, %v806_v27 }
 0x69a   :  { %2995 = vtanh.f32 %v641_v31 }
 0x69b   :  { %v2992_v29 = vpop.eup %2991  ;;  %2997 = vtanh.f32 %v809_v32 }
 0x69c   :  { %648 = vrot.lane.b32.xlu0 %v2992_v29, %s3148_s1 }
 0x6a3   :  { %v2994_v30 = vpop.eup %2993 }
 0x6a4   :  { %816 = vrot.lane.b32.xlu1 %v2994_v30, %s3148_s1  ;;  %v2996_v34 = vpop.eup %2995 }
 0x6a5   :  { %v643_v36 = vadd.f32 1.0, %v2996_v34  ;;  %v2998_v39 = vpop.eup %2997 }
 0x6a6   :  { %v811_v43 = vadd.f32 1.0, %v2998_v39 }
 0x6a7   :  { %v644_v37 = vmul.f32 0.5, %v643_v36 }
 0x6a8   :  { %v812_v44 = vmul.f32 0.5, %v811_v43 }
 0x6a9   :  { %v646_v48 = vmul.f32 %v644_v37, %v3268_v9 }
 0x6aa   :  { %v814_v51 = vmul.f32 %v812_v44, %v3272_v13 }
 0x70e   :  { %v649_v40 = vpop.permute.xlu0 %648 }
 0x70f   :  { %v651_v41 = vmul.f32 %v649_v40, %v644_v37 }
 0x711   :  { %653 = vrot.lane.b32.xlu0 %v651_v41, %s3149_s6 }
 0x716   :  { %v817_v45 = vpop.permute.xlu1 %816 }
 0x717   :  { %v819_v47 = vmul.f32 %v817_v45, %v812_v44 }
 0x719   :  { %821 = vrot.lane.b32.xlu1 %v819_v47, %s3149_s6 }
 0x783   :  { %v654_v49 = vpop.permute.xlu0 %653 }
 0x784   :  { %v3306_v50 = vadd.f32 %v654_v49, %v646_v48 }
 0x786   :  { %2999 = vtanh.f32 %v3306_v50 }
 0x78b   :  { %v822_v52 = vpop.permute.xlu1 %821 }
 0x78c   :  { %v3310_v53 = vadd.f32 %v822_v52, %v814_v51 }
 0x78e   :  { %3001 = vtanh.f32 %v3310_v53 }
 0x790   :  { %v3000_v54 = vpop.eup %2999 }
 0x791   :  { %659 = vrot.lane.b32.xlu0 %v3000_v54, %s3148_s1 }
 0x798   :  { %v3002_v55 = vpop.eup %3001 }
 0x799   :  { %827 = vrot.lane.b32.xlu1 %v3002_v55, %s3148_s1 }
 0x803   :  { %v660_v56 = vpop.permute.xlu0 %659 }
 0x804   :  { %v662_v57 = vmul.f32 %v660_v56, %v644_v37 }
 0x806   :  { %664 = vrot.lane.b32.xlu0 %v662_v57, %s3149_s6 }
 0x80b   :  { %v828_v58 = vpop.permute.xlu1 %827 }
 0x80c   :  { %v830_v59 = vmul.f32 %v828_v58, %v812_v44  ;;  %v1268_v44 = vld [vmem:[#allocation2 + $0x4] sm:$0x1] }
 0x80e   :  { %832 = vrot.lane.b32.xlu1 %v830_v59, %s3149_s6 }
 0x878   :  { %v665_v60 = vpop.permute.xlu0 %664 }
 0x879   :  { %2586 = vmatmul.mubr.msk.f32.vlgmr.msra.gmra.mrb[4].mxu1 %vm134_vm2, %v665_v60 }
 0x87a   :  { %2839 = vmatpush3.bf16.msra.mxu1 %v3231_v38  ;;  %2607 = vmatprep.mubr.msk.f32.mxu1 %vm3146_vm0, %v3147_v1 }
 0x87b   :  { %2840 = vmatprep.subr.bf16.mxu1 %v3145_v0 }
 0x87e   :  { %2842 = vmatpush3.bf16.msra.mxu1 %v3239_v42 }
 0x87f   :  { %2849 = vmatprep.subr.bf16.mxu1 %v3145_v0 }
 0x880   :  { %v833_v61 = vpop.permute.xlu1 %832 }
 0x881   :  { %2608 = vmatmul.mubr.msk.f32.vlgmr.msra.gmra.mrb[4].mxu1 %vm134_vm2, %v833_v61 }
 0x882   :  { %2851 = vmatpush3.bf16.msra.mxu1 %v3203_v8  ;;  %2629 = vmatprep.mubr.msk.f32.mxu1 %vm3146_vm0, %v3147_v1 }
 0x883   :  { %2852 = vmatprep.subr.bf16.mxu1 %v3145_v0 }
 0x886   :  { %2854 = vmatpush3.bf16.msra.mxu1 %v3207_v11 }
 0x887   :  { %2861 = vmatprep.subr.bf16.mxu1 %v3145_v0 }
 0x889   :  { %2630 = vmatmul.mubr.msk.f32.vlgmr.msra.gmra.mrb[6].mxu1 %vm134_vm2, %v833_v61 }
 0x88a   :  { %2863 = vmatpush3.bf16.msra.mxu1 %v3222_v33  ;;  %2651 = vmatprep.mubr.msk.f32.mxu1 %vm3146_vm0, %v3147_v1 }
 0x88b   :  { %2864 = vmatprep.subr.bf16.mxu1 %v3145_v0 }
 0x88e   :  { %2866 = vmatpush3.bf16.msra.mxu1 %v3225_v35 }
 0x88f   :  { %2873 = vmatprep.subr.bf16.mxu1 %v3145_v0 }
 0x954   :  { %v902_v62 = vpop.f32.mrb[4].mxu1 }
 0x955   :  { %v2941_v63 = vadd.f32 %v902_v62, %v3261_v46  ;;  %v2609_v2 = vpop.f32.mrb[5].mxu1 }
 0x957   :  { %3003 = vtanh.f32 %v2941_v63  ;;  %v906_v10 = vmul.f32 0.5, %v2941_v63 }
 0x95c   :  { %v1070_v4 = vpop.f32.mrb[6].mxu1 }
 0x95d   :  { %v1071_v5 = vadd.f32 %v1070_v4, %v1003_v3  ;;  %v2631_v6 = vpop.f32.mrb[7].mxu1 }
 0x95f   :  { %3005 = vtanh.f32 %v1071_v5  ;;  %v1074_v12 = vmul.f32 0.5, %v1071_v5 }
 0x960   :  { %3007 = vtanh.f32 %v906_v10 }
 0x961   :  { %v3004_v7 = vpop.eup %3003  ;;  %3009 = vtanh.f32 %v1074_v12 }
 0x962   :  { %913 = vrot.lane.b32.xlu0 %v3004_v7, %s3148_s1 }
 0x969   :  { %v3006_v9 = vpop.eup %3005 }
 0x96a   :  { %1081 = vrot.lane.b32.xlu1 %v3006_v9, %s3148_s1  ;;  %v3008_v13 = vpop.eup %3007 }
 0x96b   :  { %v908_v14 = vadd.f32 1.0, %v3008_v13  ;;  %v3010_v16 = vpop.eup %3009 }
 0x96c   :  { %v1076_v19 = vadd.f32 1.0, %v3010_v16 }
 0x96d   :  { %v909_v15 = vmul.f32 0.5, %v908_v14 }
 0x96e   :  { %v1077_v20 = vmul.f32 0.5, %v1076_v19 }
 0x96f   :  { %v911_v23 = vmul.f32 %v909_v15, %v3306_v50 }
 0x970   :  { %v1079_v26 = vmul.f32 %v1077_v20, %v3310_v53 }
 0x9d4   :  { %v914_v17 = vpop.permute.xlu0 %913 }
 0x9d5   :  { %v916_v18 = vmul.f32 %v914_v17, %v909_v15 }
 0x9d7   :  { %918 = vrot.lane.b32.xlu0 %v916_v18, %s3149_s6 }
 0x9dc   :  { %v1082_v21 = vpop.permute.xlu1 %1081 }
 0x9dd   :  { %v1084_v22 = vmul.f32 %v1082_v21, %v1077_v20 }
 0x9df   :  { %1086 = vrot.lane.b32.xlu1 %v1084_v22, %s3149_s6 }
 0xa49   :  { %v919_v24 = vpop.permute.xlu0 %918 }
 0xa4a   :  { %v3344_v25 = vadd.f32 %v919_v24, %v911_v23 }
 0xa4c   :  { %3011 = vtanh.f32 %v3344_v25 }
 0xa51   :  { %v1087_v27 = vpop.permute.xlu1 %1086 }
 0xa52   :  { %v3348_v28 = vadd.f32 %v1087_v27, %v1079_v26 }
 0xa54   :  { %3013 = vtanh.f32 %v3348_v28 }
 0xa56   :  { %v3012_v29 = vpop.eup %3011 }
 0xa57   :  { %924 = vrot.lane.b32.xlu0 %v3012_v29, %s3148_s1 }
 0xa5e   :  { %v3014_v30 = vpop.eup %3013 }
 0xa5f   :  { %1092 = vrot.lane.b32.xlu1 %v3014_v30, %s3148_s1 }
 0xac9   :  { %v925_v31 = vpop.permute.xlu0 %924 }
 0xaca   :  { %v927_v32 = vmul.f32 %v925_v31, %v909_v15 }
 0xacc   :  { %929 = vrot.lane.b32.xlu0 %v927_v32, %s3149_s6 }
 0xad1   :  { %v1093_v34 = vpop.permute.xlu1 %1092 }
 0xad2   :  { %v1095_v36 = vmul.f32 %v1093_v34, %v1077_v20  ;;  %v1533_v20 = vld [vmem:[#allocation2 + $0x5] sm:$0x1] }
 0xad4   :  { %1097 = vrot.lane.b32.xlu1 %v1095_v36, %s3149_s6 }
 0xb3e   :  { %v930_v37 = vpop.permute.xlu0 %929 }
 0xb3f   :  { %2619 = vmatmul.mubr.msk.f32.vlgmr.msra.gmra.mrb[8].mxu0 %vm134_vm2, %v930_v37 }
 0xb40   :  { %2857 = vmatpush3.bf16.msra.mxu0 %v3231_v38  ;;  %2640 = vmatprep.mubr.msk.f32.mxu0 %vm3146_vm0, %v3147_v1 }
 0xb41   :  { %2858 = vmatprep.subr.bf16.mxu0 %v3145_v0 }
 0xb44   :  { %2860 = vmatpush3.bf16.msra.mxu0 %v3239_v42 }
 0xb45   :  { %2867 = vmatprep.subr.bf16.mxu0 %v3145_v0 }
 0xb46   :  { %v1098_v39 = vpop.permute.xlu1 %1097 }
 0xb47   :  { %2641 = vmatmul.mubr.msk.f32.vlgmr.msra.gmra.mrb[8].mxu0 %vm134_vm2, %v1098_v39 }
 0xb48   :  { %2869 = vmatpush3.bf16.msra.mxu0 %v3203_v8  ;;  %2662 = vmatprep.mubr.msk.f32.mxu0 %vm3146_vm0, %v3147_v1 }
 0xb49   :  { %2870 = vmatprep.subr.bf16.mxu0 %v3145_v0 }
 0xb4c   :  { %2872 = vmatpush3.bf16.msra.mxu0 %v3207_v11 }
 0xb4d   :  { %2879 = vmatprep.subr.bf16.mxu0 %v3145_v0 }
 0xb4f   :  { %2663 = vmatmul.mubr.msk.f32.vlgmr.msra.gmra.mrb[10].mxu0 %vm134_vm2, %v1098_v39 }
 0xb50   :  { %2881 = vmatpush3.bf16.msra.mxu0 %v3222_v33  ;;  %2684 = vmatprep.mubr.msk.f32.mxu0 %vm3146_vm0, %v3147_v1 }
 0xb51   :  { %2882 = vmatprep.subr.bf16.mxu0 %v3145_v0 }
 0xb54   :  { %2884 = vmatpush3.bf16.msra.mxu0 %v3225_v35 }
 0xb55   :  { %2891 = vmatprep.subr.bf16.mxu0 %v3145_v0 }
 0xc1a   :  { %v1167_v40 = vpop.f32.mrb[8].mxu0 }
 0xc1b   :  { %v2942_v41 = vadd.f32 %v1167_v40, %v3261_v46  ;;  %v2642_v43 = vpop.f32.mrb[9].mxu0 }
 0xc1d   :  { %3015 = vtanh.f32 %v2942_v41  ;;  %v1171_v51 = vmul.f32 0.5, %v2942_v41 }
 0xc22   :  { %v1335_v45 = vpop.f32.mrb[10].mxu0 }
 0xc23   :  { %v1336_v47 = vadd.f32 %v1335_v45, %v1268_v44  ;;  %v2664_v48 = vpop.f32.mrb[11].mxu0 }
 0xc25   :  { %3017 = vtanh.f32 %v1336_v47  ;;  %v1339_v52 = vmul.f32 0.5, %v1336_v47 }
 0xc26   :  { %3019 = vtanh.f32 %v1171_v51 }
 0xc27   :  { %v3016_v49 = vpop.eup %3015  ;;  %3021 = vtanh.f32 %v1339_v52 }
 0xc28   :  { %1178 = vrot.lane.b32.xlu0 %v3016_v49, %s3148_s1 }
 0xc2f   :  { %v3018_v50 = vpop.eup %3017 }
 0xc30   :  { %1346 = vrot.lane.b32.xlu1 %v3018_v50, %s3148_s1  ;;  %v3020_v53 = vpop.eup %3019 }
 0xc31   :  { %v1173_v54 = vadd.f32 1.0, %v3020_v53  ;;  %v3022_v56 = vpop.eup %3021 }
 0xc32   :  { %v1341_v59 = vadd.f32 1.0, %v3022_v56 }
 0xc33   :  { %v1174_v55 = vmul.f32 0.5, %v1173_v54 }
 0xc34   :  { %v1342_v60 = vmul.f32 0.5, %v1341_v59 }
 0xc35   :  { %v1176_v63 = vmul.f32 %v1174_v55, %v3344_v25 }
 0xc36   :  { %v1344_v4 = vmul.f32 %v1342_v60, %v3348_v28 }
 0xc9a   :  { %v1179_v57 = vpop.permute.xlu0 %1178 }
 0xc9b   :  { %v1181_v58 = vmul.f32 %v1179_v57, %v1174_v55 }
 0xc9d   :  { %1183 = vrot.lane.b32.xlu0 %v1181_v58, %s3149_s6 }
 0xca2   :  { %v1347_v61 = vpop.permute.xlu1 %1346 }
 0xca3   :  { %v1349_v62 = vmul.f32 %v1347_v61, %v1342_v60 }
 0xca5   :  { %1351 = vrot.lane.b32.xlu1 %v1349_v62, %s3149_s6 }
 0xd0f   :  { %v1184_v2 = vpop.permute.xlu0 %1183 }
 0xd10   :  { %v3382_v3 = vadd.f32 %v1184_v2, %v1176_v63 }
 0xd12   :  { %3023 = vtanh.f32 %v3382_v3 }
 0xd17   :  { %v1352_v5 = vpop.permute.xlu1 %1351 }
 0xd18   :  { %v3386_v6 = vadd.f32 %v1352_v5, %v1344_v4 }
 0xd1a   :  { %3025 = vtanh.f32 %v3386_v6 }
 0xd1c   :  { %v3024_v7 = vpop.eup %3023 }
 0xd1d   :  { %1189 = vrot.lane.b32.xlu0 %v3024_v7, %s3148_s1 }
 0xd24   :  { %v3026_v9 = vpop.eup %3025 }
 0xd25   :  { %1357 = vrot.lane.b32.xlu1 %v3026_v9, %s3148_s1 }
 0xd8f   :  { %v1190_v10 = vpop.permute.xlu0 %1189 }
 0xd90   :  { %v1192_v12 = vmul.f32 %v1190_v10, %v1174_v55 }
 0xd92   :  { %1194 = vrot.lane.b32.xlu0 %v1192_v12, %s3149_s6 }
 0xd97   :  { %v1358_v13 = vpop.permute.xlu1 %1357 }
 0xd98   :  { %v1360_v14 = vmul.f32 %v1358_v13, %v1342_v60  ;;  %v1798_v60 = vld [vmem:[#allocation2 + $0x6] sm:$0x1] }
 0xd9a   :  { %1362 = vrot.lane.b32.xlu1 %v1360_v14, %s3149_s6 }
 0xe04   :  { %v1195_v15 = vpop.permute.xlu0 %1194 }
 0xe05   :  { %2652 = vmatmul.mubr.msk.f32.vlgmr.msra.gmra.mrb[8].mxu1 %vm134_vm2, %v1195_v15 }
 0xe06   :  { %2875 = vmatpush3.bf16.msra.mxu1 %v3231_v38  ;;  %2673 = vmatprep.mubr.msk.f32.mxu1 %vm3146_vm0, %v3147_v1 }
 0xe07   :  { %2876 = vmatprep.subr.bf16.mxu1 %v3145_v0 }
 0xe0a   :  { %2878 = vmatpush3.bf16.msra.mxu1 %v3239_v42 }
 0xe0b   :  { %2885 = vmatprep.subr.bf16.mxu1 %v3145_v0 }
 0xe0c   :  { %v1363_v16 = vpop.permute.xlu1 %1362 }
 0xe0d   :  { %2674 = vmatmul.mubr.msk.f32.vlgmr.msra.gmra.mrb[8].mxu1 %vm134_vm2, %v1363_v16 }
 0xe0e   :  { %2887 = vmatpush3.bf16.msra.mxu1 %v3203_v8  ;;  %2695 = vmatprep.mubr.msk.f32.mxu1 %vm3146_vm0, %v3147_v1 }
 0xe0f   :  { %2888 = vmatprep.subr.bf16.mxu1 %v3145_v0 }
 0xe12   :  { %2890 = vmatpush3.bf16.msra.mxu1 %v3207_v11 }
 0xe13   :  { %2897 = vmatprep.subr.bf16.mxu1 %v3145_v0 }
 0xe15   :  { %2696 = vmatmul.mubr.msk.f32.vlgmr.msra.gmra.mrb[10].mxu1 %vm134_vm2, %v1363_v16 }
 0xe16   :  { %2899 = vmatpush3.bf16.msra.mxu1 %v3222_v33  ;;  %2717 = vmatprep.mubr.msk.f32.mxu1 %vm3146_vm0, %v3147_v1 }
 0xe17   :  { %2900 = vmatprep.subr.bf16.mxu1 %v3145_v0 }
 0xe1a   :  { %2902 = vmatpush3.bf16.msra.mxu1 %v3225_v35 }
 0xe1b   :  { %2909 = vmatprep.subr.bf16.mxu1 %v3145_v0 }
 0xee0   :  { %v1432_v17 = vpop.f32.mrb[8].mxu1 }
 0xee1   :  { %v2943_v18 = vadd.f32 %v1432_v17, %v3261_v46  ;;  %v2675_v19 = vpop.f32.mrb[9].mxu1 }
 0xee3   :  { %3027 = vtanh.f32 %v2943_v18  ;;  %v1436_v26 = vmul.f32 0.5, %v2943_v18 }
 0xee8   :  { %v1600_v21 = vpop.f32.mrb[10].mxu1 }
 0xee9   :  { %v1601_v22 = vadd.f32 %v1600_v21, %v1533_v20  ;;  %v2697_v23 = vpop.f32.mrb[11].mxu1 }
 0xeeb   :  { %3029 = vtanh.f32 %v1601_v22  ;;  %v1604_v27 = vmul.f32 0.5, %v1601_v22 }
 0xeec   :  { %3031 = vtanh.f32 %v1436_v26 }
 0xeed   :  { %v3028_v24 = vpop.eup %3027  ;;  %3033 = vtanh.f32 %v1604_v27 }
 0xeee   :  { %1443 = vrot.lane.b32.xlu0 %v3028_v24, %s3148_s1 }
 0xef5   :  { %v3030_v25 = vpop.eup %3029 }
 0xef6   :  { %1611 = vrot.lane.b32.xlu1 %v3030_v25, %s3148_s1  ;;  %v3032_v28 = vpop.eup %3031 }
 0xef7   :  { %v1438_v29 = vadd.f32 1.0, %v3032_v28  ;;  %v3034_v31 = vpop.eup %3033 }
 0xef8   :  { %v1606_v36 = vadd.f32 1.0, %v3034_v31 }
 0xef9   :  { %v1439_v30 = vmul.f32 0.5, %v1438_v29 }
 0xefa   :  { %v1607_v37 = vmul.f32 0.5, %v1606_v36 }
 0xefb   :  { %v1441_v41 = vmul.f32 %v1439_v30, %v3382_v3 }
 0xefc   :  { %v1609_v45 = vmul.f32 %v1607_v37, %v3386_v6 }
 0xf60   :  { %v1444_v32 = vpop.permute.xlu0 %1443 }
 0xf61   :  { %v1446_v34 = vmul.f32 %v1444_v32, %v1439_v30 }
 0xf63   :  { %1448 = vrot.lane.b32.xlu0 %v1446_v34, %s3149_s6 }
 0xf68   :  { %v1612_v39 = vpop.permute.xlu1 %1611 }
 0xf69   :  { %v1614_v40 = vmul.f32 %v1612_v39, %v1607_v37 }
 0xf6b   :  { %1616 = vrot.lane.b32.xlu1 %v1614_v40, %s3149_s6 }
 0xfd5   :  { %v1449_v43 = vpop.permute.xlu0 %1448 }
 0xfd6   :  { %v3420_v44 = vadd.f32 %v1449_v43, %v1441_v41 }
 0xfd8   :  { %3035 = vtanh.f32 %v3420_v44 }
 0xfdd   :  { %v1617_v47 = vpop.permute.xlu1 %1616 }
 0xfde   :  { %v3424_v48 = vadd.f32 %v1617_v47, %v1609_v45 }
 0xfe0   :  { %3037 = vtanh.f32 %v3424_v48 }
 0xfe2   :  { %v3036_v49 = vpop.eup %3035 }
 0xfe3   :  { %1454 = vrot.lane.b32.xlu0 %v3036_v49, %s3148_s1 }
 0xfea   :  { %v3038_v50 = vpop.eup %3037 }
 0xfeb   :  { %1622 = vrot.lane.b32.xlu1 %v3038_v50, %s3148_s1 }
0x1055   :  { %v1455_v51 = vpop.permute.xlu0 %1454 }
0x1056   :  { %v1457_v52 = vmul.f32 %v1455_v51, %v1439_v30 }
0x1058   :  { %1459 = vrot.lane.b32.xlu0 %v1457_v52, %s3149_s6 }
0x105d   :  { %v1623_v53 = vpop.permute.xlu1 %1622 }
0x105e   :  { %v1625_v54 = vmul.f32 %v1623_v53, %v1607_v37 }
0x1060   :  { %1627 = vrot.lane.b32.xlu1 %v1625_v54, %s3149_s6 }
0x10ca   :  { %v1460_v55 = vpop.permute.xlu0 %1459 }
0x10cb   :  { %2685 = vmatmul.mubr.msk.f32.vlgmr.msra.gmra.mrb[12].mxu0 %vm134_vm2, %v1460_v55 }
0x10cc   :  { %2893 = vmatpush3.bf16.msra.mxu0 %v3231_v38  ;;  %2706 = vmatprep.mubr.msk.f32.mxu0 %vm3146_vm0, %v3147_v1 }
0x10cd   :  { %2894 = vmatprep.subr.bf16.mxu0 %v3145_v0 }
0x10d0   :  { %2896 = vmatpush3.bf16.msra.mxu0 %v3239_v42 }
0x10d1   :  { %2903 = vmatprep.subr.bf16.mxu0 %v3145_v0 }
0x10d2   :  { %v1628_v56 = vpop.permute.xlu1 %1627 }
0x10d3   :  { %2707 = vmatmul.mubr.msk.f32.vlgmr.msra.gmra.mrb[12].mxu0 %vm134_vm2, %v1628_v56 }
0x10d4   :  { %2905 = vmatpush3.bf16.msra.mxu0 %v3203_v8  ;;  %2728 = vmatprep.mubr.msk.f32.mxu0 %vm3146_vm0, %v3147_v1 }
0x10d5   :  { %2906 = vmatprep.subr.bf16.mxu0 %v3145_v0 }
0x10d8   :  { %2908 = vmatpush3.bf16.msra.mxu0 %v3207_v11 }
0x10d9   :  { %2915 = vmatprep.subr.bf16.mxu0 %v3145_v0 }
0x10db   :  { %2729 = vmatmul.mubr.msk.f32.vlgmr.msra.gmra.mrb[14].mxu0 %vm134_vm2, %v1628_v56 }
0x10dc   :  { %2917 = vmatpush3.bf16.msra.mxu0 %v3222_v33  ;;  %2750 = vmatprep.mubr.msk.f32.mxu0 %vm3146_vm0, %v3147_v1 }
0x10dd   :  { %2918 = vmatprep.subr.bf16.mxu0 %v3145_v0 }
0x10e0   :  { %2920 = vmatpush3.bf16.msra.mxu0 %v3225_v35 }
0x10e1   :  { %2927 = vmatprep.subr.bf16.mxu0 %v3145_v0 }
0x11a6   :  { %v1697_v57 = vpop.f32.mrb[12].mxu0 }
0x11a7   :  { %v2944_v58 = vadd.f32 %v1697_v57, %v3261_v46  ;;  %v2708_v59 = vpop.f32.mrb[13].mxu0 }
0x11a9   :  { %3039 = vtanh.f32 %v2944_v58  ;;  %v1701_v3 = vmul.f32 0.5, %v2944_v58 }
0x11ae   :  { %v1865_v61 = vpop.f32.mrb[14].mxu0 }
0x11af   :  { %v1866_v62 = vadd.f32 %v1865_v61, %v1798_v60  ;;  %v2730_v63 = vpop.f32.mrb[15].mxu0 }
0x11b1   :  { %3041 = vtanh.f32 %v1866_v62  ;;  %v1869_v35 = vmul.f32 0.5, %v1866_v62 }
0x11b2   :  { %3043 = vtanh.f32 %v1701_v3 }
0x11b3   :  { %v3040_v33 = vpop.eup %3039  ;;  %3045 = vtanh.f32 %v1869_v35 }
0x11b4   :  { %1708 = vrot.lane.b32.xlu0 %v3040_v33, %s3148_s1 }
0x11bb   :  { %v3042_v2 = vpop.eup %3041 }
0x11bc   :  { %1876 = vrot.lane.b32.xlu1 %v3042_v2, %s3148_s1  ;;  %v3044_v4 = vpop.eup %3043 }
0x11bd   :  { %v1703_v5 = vadd.f32 1.0, %v3044_v4  ;;  %v3046_v7 = vpop.eup %3045 }
0x11be   :  { %v1871_v12 = vadd.f32 1.0, %v3046_v7 }
0x11bf   :  { %v1704_v6 = vmul.f32 0.5, %v1703_v5 }
0x11c0   :  { %v1872_v13 = vmul.f32 0.5, %v1871_v12 }
0x11c1   :  { %v1706_v16 = vmul.f32 %v1704_v6, %v3420_v44 }
0x11c2   :  { %v1874_v19 = vmul.f32 %v1872_v13, %v3424_v48 }
0x1226   :  { %v1709_v9 = vpop.permute.xlu0 %1708 }
0x1227   :  { %v1711_v10 = vmul.f32 %v1709_v9, %v1704_v6 }
0x1229   :  { %1713 = vrot.lane.b32.xlu0 %v1711_v10, %s3149_s6 }
0x122e   :  { %v1877_v14 = vpop.permute.xlu1 %1876 }
0x122f   :  { %v1879_v15 = vmul.f32 %v1877_v14, %v1872_v13 }
0x1231   :  { %1881 = vrot.lane.b32.xlu1 %v1879_v15, %s3149_s6 }
0x129b   :  { %v1714_v17 = vpop.permute.xlu0 %1713 }
0x129c   :  { %v1716_v18 = vadd.f32 %v1714_v17, %v1706_v16  ;;  %v2253_v16 = vld [vmem:[#allocation6 + $0x80] sm:$0xff]  ;;  %v2255_v17 = vld [vmem:[#allocation6 + $0x90] sm:$0xff] }
0x129e   :  { %3047 = vtanh.f32 %v1716_v18 }
0x12a3   :  { %v1882_v20 = vpop.permute.xlu1 %1881 }
0x12a4   :  { %v1884_v21 = vadd.f32 %v1882_v20, %v1874_v19  ;;  %v2256_v19 = vld [vmem:[#allocation6 + $0x98] sm:$0xff] }
0x12a5   :  { %v2937_v20 = vpack.c.bf16 %v2256_v19, %v2255_v17 }
0x12a6   :  { %3049 = vtanh.f32 %v1884_v21 }
0x12a8   :  { %v3048_v22 = vpop.eup %3047 }
0x12a9   :  { %1719 = vrot.lane.b32.xlu0 %v3048_v22, %s3148_s1 }
0x12b0   :  { %v3050_v23 = vpop.eup %3049 }
0x12b1   :  { %1887 = vrot.lane.b32.xlu1 %v3050_v23, %s3148_s1 }
0x131b   :  { %v1720_v24 = vpop.permute.xlu0 %1719 }
0x131c   :  { %v1722_v25 = vmul.f32 %v1720_v24, %v1704_v6 }
0x131e   :  { %1724 = vrot.lane.b32.xlu0 %v1722_v25, %s3149_s6  ;;  %v2257_v25 = vld [vmem:[#allocation6 + $0xa0] sm:$0x1] }
0x1323   :  { %v1888_v26 = vpop.permute.xlu1 %1887 }
0x1324   :  { %v1890_v27 = vmul.f32 %v1888_v26, %v1872_v13 }
0x1326   :  { %1892 = vrot.lane.b32.xlu1 %v1890_v27, %s3149_s6 }
0x1390   :  { %v1725_v28 = vpop.permute.xlu0 %1724 }
0x1391   :  { %2718 = vmatmul.mubr.msk.f32.vlgmr.msra.gmra.mrb[12].mxu1 %vm134_vm2, %v1725_v28 }
0x1392   :  { %2911 = vmatpush3.bf16.msra.mxu1 %v3231_v38  ;;  %2739 = vmatprep.mubr.msk.f32.mxu1 %vm3146_vm0, %v3147_v1 }
0x1393   :  { %2912 = vmatprep.subr.bf16.mxu1 %v3145_v0 }
0x1396   :  { %2914 = vmatpush3.bf16.msra.mxu1 %v3239_v42 }
0x1397   :  { %2921 = vmatprep.subr.bf16.mxu1 %v3145_v0 }
0x1398   :  { %v1893_v29 = vpop.permute.xlu1 %1892 }
0x1399   :  { %2740 = vmatmul.mubr.msk.f32.vlgmr.msra.gmra.mrb[12].mxu1 %vm134_vm2, %v1893_v29 }
0x139a   :  { %2923 = vmatpush3.bf16.msra.mxu1 %v3203_v8  ;;  %2761 = vmatprep.mubr.msk.f32.mxu1 %vm3146_vm0, %v3147_v1  ;;  %v2063_v8 = vld [vmem:[#allocation2 + $0x7] sm:$0x1] }
0x139b   :  { %2924 = vmatprep.subr.bf16.mxu1 %v3145_v0 }
0x139e   :  { %2926 = vmatpush3.bf16.msra.mxu1 %v3207_v11 }
0x139f   :  { %2933 = vmatprep.subr.bf16.mxu1 %v3145_v0 }
0x13a1   :  { %2762 = vmatmul.mubr.msk.f32.vlgmr.msra.gmra.mrb[14].mxu1 %vm134_vm2, %v1893_v29 }
0x13a2   :  { %2783 = vmatprep.mubr.msk.f32.mxu1 %vm3146_vm0, %v3147_v1 }
0x146c   :  { %v1962_v30 = vpop.f32.mrb[12].mxu1 }
0x146d   :  { %v2945_v31 = vadd.f32 %v1962_v30, %v3261_v46  ;;  %v2741_v32 = vpop.f32.mrb[13].mxu1 }
0x146f   :  { %3051 = vtanh.f32 %v2945_v31  ;;  %v1966_v40 = vmul.f32 0.5, %v2945_v31 }
0x1474   :  { %v2130_v34 = vpop.f32.mrb[14].mxu1 }
0x1475   :  { %v2131_v36 = vadd.f32 %v2130_v34, %v2063_v8  ;;  %v2763_v37 = vpop.f32.mrb[15].mxu1 }
0x1477   :  { %3053 = vtanh.f32 %v2131_v36  ;;  %v2134_v41 = vmul.f32 0.5, %v2131_v36 }
0x1478   :  { %3055 = vtanh.f32 %v1966_v40 }
0x1479   :  { %v3052_v39 = vpop.eup %3051  ;;  %3057 = vtanh.f32 %v2134_v41 }
0x147a   :  { %1973 = vrot.lane.b32.xlu0 %v3052_v39, %s3148_s1 }
0x1481   :  { %v3054_v11 = vpop.eup %3053 }
0x1482   :  { %2141 = vrot.lane.b32.xlu1 %v3054_v11, %s3148_s1  ;;  %v3056_v43 = vpop.eup %3055 }
0x1483   :  { %v1968_v44 = vadd.f32 1.0, %v3056_v43  ;;  %v3058_v47 = vpop.eup %3057 }
0x1484   :  { %v2136_v50 = vadd.f32 1.0, %v3058_v47 }
0x1485   :  { %v1969_v45 = vmul.f32 0.5, %v1968_v44 }
0x1486   :  { %v2137_v51 = vmul.f32 0.5, %v2136_v50 }
0x1487   :  { %v1971_v54 = vmul.f32 %v1969_v45, %v1716_v18 }
0x1488   :  { %v2139_v57 = vmul.f32 %v2137_v51, %v1884_v21 }
0x14ec   :  { %v1974_v48 = vpop.permute.xlu0 %1973 }
0x14ed   :  { %v1976_v49 = vmul.f32 %v1974_v48, %v1969_v45 }
0x14ef   :  { %1978 = vrot.lane.b32.xlu0 %v1976_v49, %s3149_s6 }
0x14f4   :  { %v2142_v52 = vpop.permute.xlu1 %2141 }
0x14f5   :  { %v2144_v53 = vmul.f32 %v2142_v52, %v2137_v51 }
0x14f7   :  { %2146 = vrot.lane.b32.xlu1 %v2144_v53, %s3149_s6 }
0x1561   :  { %v1979_v55 = vpop.permute.xlu0 %1978 }
0x1562   :  { %v1981_v56 = vadd.f32 %v1979_v55, %v1971_v54 }
0x1564   :  { %3059 = vtanh.f32 %v1981_v56 }
0x1569   :  { %v2147_v58 = vpop.permute.xlu1 %2146 }
0x156a   :  { %v2149_v59 = vadd.f32 %v2147_v58, %v2139_v57 }
0x156c   :  { %3061 = vtanh.f32 %v2149_v59 }
0x156e   :  { %v3060_v60 = vpop.eup %3059 }
0x156f   :  { %1984 = vrot.lane.b32.xlu0 %v3060_v60, %s3148_s1 }
0x1576   :  { %v3062_v61 = vpop.eup %3061 }
0x1577   :  { %2152 = vrot.lane.b32.xlu1 %v3062_v61, %s3148_s1 }
0x15e1   :  { %v1985_v62 = vpop.permute.xlu0 %1984 }
0x15e2   :  { %v1987_v63 = vmul.f32 %v1985_v62, %v1969_v45 }
0x15e4   :  { %1989 = vrot.lane.b32.xlu0 %v1987_v63, %s3149_s6 }
0x15e9   :  { %v2153_v33 = vpop.permute.xlu1 %2152 }
0x15ea   :  { %v2155_v2 = vmul.f32 %v2153_v33, %v2137_v51 }
0x15ec   :  { %2157 = vrot.lane.b32.xlu1 %v2155_v2, %s3149_s6 }
0x1656   :  { %v1990_v3 = vpop.permute.xlu0 %1989 }
0x1657   :  { %2751 = vmatmul.mubr.msk.f32.vlgmr.msra.gmra.mrb[16].mxu0 %vm134_vm2, %v1990_v3 }
0x1658   :  { %2929 = vmatpush3.bf16.msra.mxu0 %v3231_v38  ;;  %2772 = vmatprep.mubr.msk.f32.mxu0 %vm3146_vm0, %v3147_v1 }
0x1659   :  { %2930 = vmatprep.subr.bf16.mxu0 %v3145_v0 }
0x165c   :  { %2932 = vmatpush3.bf16.msra.mxu0 %v3239_v42 }
0x165e   :  { %v2158_v35 = vpop.permute.xlu1 %2157 }
0x165f   :  { %2773 = vmatmul.mubr.msk.f32.vlgmr.msra.gmra.mrb[16].mxu0 %vm134_vm2, %v2158_v35 }
0x1732   :  { %v2227_v4 = vpop.f32.mrb[16].mxu0 }
0x1733   :  { %v2946_v5 = vadd.f32 %v2227_v4, %v3261_v46  ;;  %v2774_v6 = vpop.f32.mrb[17].mxu0  ;;  %v2254_v46 = vld [vmem:[#allocation6 + $0x88] sm:$0xff] }
0x1734   :  { %v2934_v18 = vpack.c.bf16 %v2254_v46, %v2253_v16 }
0x1735   :  { %3063 = vtanh.f32 %v2946_v5  ;;  %v2231_v9 = vmul.f32 0.5, %v2946_v5 }
0x1736   :  { %2935 = vmatpush3.bf16.msra.mxu1 %v2934_v18 }
0x1737   :  { %3065 = vtanh.f32 %v2231_v9  ;;  %2936 = vmatprep.subr.bf16.mxu1 %v3145_v0 }
0x173a   :  { %2938 = vmatpush3.bf16.msra.mxu1 %v2937_v20 }
0x173f   :  { %v3064_v7 = vpop.eup %3063 }
0x1740   :  { %2238 = vrot.lane.b32.xlu0 %v3064_v7, %s3148_s1 }
0x1741   :  { %v3066_v38 = vpop.eup %3065 }
0x1742   :  { %v2233_v10 = vadd.f32 1.0, %v3066_v38 }
0x1744   :  { %v2234_v1 = vmul.f32 0.5, %v2233_v10 }
0x1746   :  { %v2236_v42 = vmul.f32 %v2234_v1, %v1981_v56 }
0x17b2   :  { %v2239_v12 = vpop.permute.xlu0 %2238 }
0x17b3   :  { %v2241_v13 = vmul.f32 %v2239_v12, %v2234_v1 }
0x17b5   :  { %2243 = vrot.lane.b32.xlu1 %v2241_v13, %s3149_s6 }
0x1827   :  { %v2244_v14 = vpop.permute.xlu1 %2243 }
0x1828   :  { %v2246_v15 = vadd.f32 %v2244_v14, %v2236_v42 }
0x182a   :  { %3067 = vtanh.f32 %v2246_v15 }
0x1834   :  { %v3068_v21 = vpop.eup %3067 }
0x1835   :  { %2249 = vrot.lane.b32.xlu0 %v3068_v21, %s3148_s1 }
0x18a7   :  { %v2250_v22 = vpop.permute.xlu0 %2249 }
0x18a8   :  { %v2252_v23 = vmul.f32 %v2250_v22, %v2234_v1 }
0x18aa   :  { %2259 = vrot.lane.b32.xlu1 %v2252_v23, %s3149_s6 }
0x191c   :  { %v2260_v24 = vpop.permute.xlu1 %2259 }
0x191d   :  { %2784 = vmatmul.mubr.msk.f32.vlgmr.msra.gmra.mrb[16].mxu1 %vm134_vm2, %v2260_v24 }
0x19f0   :  { %v2329_v26 = vpop.f32.mrb[16].mxu1 }
0x19f1   :  { %v2330_v27 = vadd.f32 %v2329_v26, %v2257_v25  ;;  %v2785_v28 = vpop.f32.mrb[17].mxu1 }
0x19f3   :  { %2334 = vst.msk [vmem:[#allocation8] sm:$0x1] %vm2333_vm3, %v2330_v27 }
0x19f4   :  { %3124 = shalt.err (!%p3121_p6)
}
0x19f5   :  { %s3125_s13 = scalar_lea.hbm %s3517_s2, 16 }
0x19f6   :  { %p3126_p7 = scmp.ne.s32.totalorder %s3517_s2, %s3125_s13  ;;  %p3129_p8 = scmp.lt.u32.totalorder %s3125_s13, %s3517_s2 }
0x19f8   :  { %p3131_p9 = pnand %p3129_p8, %p3126_p7 }
0x19fa   :  { %3134 = shalt.err (!%p3131_p9)
}
0x19fb   :  { %2344 = dma.vmem_to_hbm [thread:$0]  %s2342_s8, 16, %s3517_s2, [#allocation5]  }
0x19fc   :  { %3139 = dma.done.wait [#allocation5], 16  }
0x19fd   :  { %3140 = vsyncadd [#allocation5], 4294967280 }
0x19fe   :  { %2348 = vsyncpa [#allocation4], 1 }
0x19ff   :  { %2349 = vsyncpa [#allocation7], 1 }
0x1a00   :  { %2350 = vsyncpa [#allocation5], 1 }

</bundles_post_ra>
